<compile_context>
chip_gen: v6e
topology: v6e:2x2x1
jax: 0.10.0
libtpu: 0.0.40
codegen_flags: <defaults>
</compile_context>

<pallas_src>
import functools

import jax
import jax.numpy as jnp
from jax import lax
from jax.experimental import pallas as pl
from jax.experimental.pallas import tpu as pltpu

LN_EPS = 1e-5  # PyTorch nn.LayerNorm default


def _round_up(x, m):
    return ((x + m - 1) // m) * m


def _cdiv(a, b):
    return (a + b - 1) // b


# ----------------------------- kernel -------------------------------------- #

def _mlp_fused_kernel(n_hidden, hidden_true, x_ref, *refs_and_out):
    """Full MLP for one row-tile: (Linear -> LN -> ReLU)* -> Linear.

    refs_and_out layout:
      [w0, b0, g0, beta0, w1, b1, g1, beta1, ..., w_last, b_last, out_ref]
    Weights are bf16 [K(_pad), H_pad]; biases are f32 [1, H_pad]; gamma/beta
    use the device-dependent epilogue dtype. All padding is zeros.
    """
    out_ref = refs_and_out[-1]
    refs = refs_and_out[:-1]

    h = x_ref[...]  # bf16 (tm, K); any padded columns are zero
    r = 0
    for l in range(n_hidden):
        w_ref, b_ref, g_ref, be_ref = refs[r], refs[r + 1], refs[r + 2], refs[r + 3]
        r += 4
        # MXU matmul in bf16 with f32 accumulation; LN statistics in f32.
        y = jnp.dot(h, w_ref[...], preferred_element_type=jnp.float32) + b_ref[...]

        # Padded columns of y are exactly 0 (zero-padded W and b), so both
        # reductions below already cover the true width only -- no iota mask.
        inv_h = 1.0 / float(hidden_true[l])
        mean = jnp.sum(y, axis=-1, keepdims=True) * inv_h
        msq = jnp.sum(y * y, axis=-1, keepdims=True) * inv_h
        var = jnp.maximum(msq - mean * mean, 0.0)

        y_n = (y - mean) * lax.rsqrt(var + LN_EPS)
        # gamma/beta + ReLU in the epilogue dtype (bf16 on v6e/v7x, f32 v5e).
        # Padded columns have gamma = beta = 0, so they stay 0 for the next
        # layer's (zero-padded) matmul.
        y_n = y_n.astype(g_ref.dtype) * g_ref[...] + be_ref[...]
        h = jnp.maximum(y_n, 0.0).astype(jnp.bfloat16)
        # dropout: identity (eval mode)

    w_ref, b_ref = refs[r], refs[r + 1]
    logits = jnp.dot(h, w_ref[...], preferred_element_type=jnp.float32) + b_ref[...]
    out_ref[...] = logits.astype(out_ref.dtype)


# ----------------------------- wrappers ------------------------------------ #

def _pad2(a, rows, cols, dtype):
    out = jnp.zeros((rows, cols), dtype)
    return out.at[: a.shape[0], : a.shape[1]].set(a.astype(dtype))


def _device_kind():
    try:
        return jax.devices()[0].device_kind.lower()
    except Exception:
        return ""


def _default_epilogue_dtype():
    # v5e/v5p have no bf16 VPU -> keep the LN/ReLU epilogue in f32 there.
    return jnp.float32 if "v5" in _device_kind() else jnp.bfloat16


def prepare_mlp_params(params, epilogue_dtype=None):
    """Zero-pad feature dims to 128 (except layer 0's true K), bf16 weights."""
    if epilogue_dtype is None:
        epilogue_dtype = _default_epilogue_dtype()
    n_hidden = len(params) - 1
    ops, hidden_true = [], []
    for i, layer in enumerate(params):
        k, h = layer["w"].shape
        # Layer 0 keeps its true K: the x block's last dim equals the full
        # array dim (legal) and avoids streaming 128-wide padded x rows.
        kp = k if i == 0 else _round_up(k, 128)
        hp = _round_up(h, 128)
        ops.append(_pad2(layer["w"], kp, hp, jnp.bfloat16))
        ops.append(_pad2(layer["b"].reshape(1, h), 1, hp, jnp.float32))
        if i < n_hidden:
            ops.append(_pad2(layer["gamma"].reshape(1, h), 1, hp, epilogue_dtype))
            ops.append(_pad2(layer["beta"].reshape(1, h), 1, hp, epilogue_dtype))
            hidden_true.append(h)
    meta = dict(
        n_hidden=n_hidden,
        hidden_true=tuple(hidden_true),
        in_true=params[0]["w"].shape[0],
        out_true=params[-1]["w"].shape[1],
        out_pad=_round_up(params[-1]["w"].shape[1], 128),
        max_hpad=max(_round_up(l["w"].shape[1], 128) for l in params),
    )
    return ops, meta


_HAS_BUFFERED = hasattr(pl, "Buffered")


def _resident_spec(shape):
    """Grid-invariant parameter block: single-buffered (fetched once)."""
    if _HAS_BUFFERED:
        return pl.BlockSpec(shape, lambda i: (0, 0), pipeline_mode=pl.Buffered(1))
    return pl.BlockSpec(shape, lambda i: (0, 0))


def mlp_apply_pallas(ops, x, *, meta, tm=256):
    """Run the fused MLP kernel, tiled over rows of x."""
    n, k = x.shape
    assert k == meta["in_true"]

    # Balanced row tiles (<= tm rows each), 16-row aligned (bf16 sublane
    # packing). Force >= 2 grid steps so both v7x TensorCores are used; the
    # extra step is ~0.35 us on single-TC chips.
    min_tiles = 2 if n >= 32 else 1
    num_tiles = max(_cdiv(n, tm), min_tiles)
    tm_eff = _round_up(_cdiv(n, num_tiles), 16)
    n_pad = tm_eff * num_tiles

    xp = x.astype(jnp.bfloat16)
    if n_pad != n:
        xp = jnp.pad(xp, ((0, n_pad - n), (0, 0)))

    in_specs = [pl.BlockSpec((tm_eff, k), lambda i: (i, 0))]
    for op in ops:
        in_specs.append(_resident_spec(op.shape))

    kernel = functools.partial(
        _mlp_fused_kernel, meta["n_hidden"], meta["hidden_true"])

    # Cost estimate (dominated by the matmuls) for XLA's scheduler.
    param_bytes = sum(int(o.size) * o.dtype.itemsize for o in ops)
    flops, pos = 0, 0
    for i in range(meta["n_hidden"] + 1):
        w = ops[pos]
        flops += 2 * n_pad * int(w.shape[0]) * int(w.shape[1])
        pos += 4 if i < meta["n_hidden"] else 2
    bytes_accessed = n_pad * k * 2 + param_bytes + n_pad * meta["out_pad"] * 4
    cost = pl.CostEstimate(
        flops=int(flops),
        transcendentals=int(n_pad * meta["n_hidden"]),  # rsqrt per row/layer
        bytes_accessed=int(bytes_accessed),
    )

    # VMEM budget: single-buffered resident params + double-buffered x/out
    # tiles + a few live (tm, H_pad) f32 intermediates per layer, with 2x
    # headroom; capped per generation (v7x has only 64 MiB physical VMEM).
    x_tile = tm_eff * k * 2
    out_tile = tm_eff * meta["out_pad"] * 4
    act = 4 * tm_eff * meta["max_hpad"] * 4
    needed = param_bytes + 2 * (x_tile + out_tile) + act
    vmem_cap = (56 << 20) if "v7" in _device_kind() else (100 << 20)
    vmem_limit = int(min(vmem_cap, max(32 << 20, 2 * needed)))

    out = pl.pallas_call(
        kernel,
        out_shape=jax.ShapeDtypeStruct((n_pad, meta["out_pad"]), jnp.float32),
        grid_spec=pltpu.PrefetchScalarGridSpec(
            num_scalar_prefetch=0,
            grid=(num_tiles,),
            in_specs=in_specs,
            out_specs=pl.BlockSpec((tm_eff, meta["out_pad"]), lambda i: (i, 0)),
        ),
        compiler_params=pltpu.CompilerParams(
            dimension_semantics=("parallel",),
            vmem_limit_bytes=vmem_limit,
        ),
        cost_estimate=cost,
    )(xp, *ops)

    return out[:n, : meta["out_true"]]


# ----------------------------- MLP model ----------------------------------- #

def init_mlp_params(key, in_feats, hiddens, n_classes):
    """Same shapes/init style as the PyTorch module (weights stored [in, out])."""
    dims = [in_feats] + list(hiddens) + [n_classes]
    params = []
    for i in range(len(dims) - 1):
        key, kw, kb = jax.random.split(key, 3)
        bound = 1.0 / jnp.sqrt(dims[i])
        w = jax.random.uniform(kw, (dims[i], dims[i + 1]), jnp.float32, -bound, bound)
        b = jax.random.uniform(kb, (dims[i + 1],), jnp.float32, -bound, bound)
        layer = {"w": w, "b": b}
        if i != len(dims) - 2:  # hidden layers get a LayerNorm
            layer["gamma"] = jnp.ones((dims[i + 1],), jnp.float32)
            layer["beta"] = jnp.zeros((dims[i + 1],), jnp.float32)
        params.append(layer)
    return params


def mlp_reference(params, features):
    """Pure-JAX f32 reference of the PyTorch forward (eval mode, ReLU, LN)."""
    h = features
    for layer in params[:-1]:
        y = h @ layer["w"] + layer["b"]
        mean = jnp.mean(y, axis=-1, keepdims=True)
        var = jnp.mean((y - mean) ** 2, axis=-1, keepdims=True)
        y = (y - mean) / jnp.sqrt(var + LN_EPS)
        y = y * layer["gamma"] + layer["beta"]
        h = jnp.maximum(y, 0.0)
    last = params[-1]
    return h @ last["w"] + last["b"]


# ----------------------------- main ----------------------------------------- #

if __name__ == "__main__":
    key = jax.random.PRNGKey(0)
    k_params, k_x = jax.random.split(key)

    batch = 300          # -> 2 balanced row tiles of 160 (was 2x256)
    in_feats = 16        # streamed at true K (no 128 padding of x)
    hiddens = [32, 48]   # padded to 128; LN statistics over the true width
    n_classes = 10       # padded to 128 for lane-dense stores, sliced back

    params = init_mlp_params(k_params, in_feats, hiddens, n_classes)
    x = jax.random.normal(k_x, (batch, in_feats), jnp.float32)

    ops, meta = prepare_mlp_params(params)
    apply_fn = jax.jit(functools.partial(mlp_apply_pallas, meta=meta, tm=256))
    logits = jax.block_until_ready(apply_fn(ops, x))
    ref = jax.block_until_ready(mlp_reference(params, x))

    assert logits.shape == (batch, n_classes)
    # bf16 matmul operands / bf16 epilogue (f32 accumulation & LN stats) vs a
    # pure-f32 reference -> loose tolerance; this is a precision choice.
    assert jnp.allclose(logits, ref, atol=5e-2, rtol=5e-2), "mismatch vs reference"
    print("KERNEL_OK")
</pallas_src>

<mosaic_0001>
module attributes {stable_mosaic.version = 11 : i64} {
  func.func @_mlp_fused_kernel(%arg0: i32, %arg1: memref<160x16xbf16, #tpu.memory_space<vmem>>, %arg2: memref<16x128xbf16, #tpu.memory_space<vmem>>, %arg3: memref<1x128xf32, #tpu.memory_space<vmem>>, %arg4: memref<1x128xbf16, #tpu.memory_space<vmem>>, %arg5: memref<1x128xbf16, #tpu.memory_space<vmem>>, %arg6: memref<128x128xbf16, #tpu.memory_space<vmem>>, %arg7: memref<1x128xf32, #tpu.memory_space<vmem>>, %arg8: memref<1x128xbf16, #tpu.memory_space<vmem>>, %arg9: memref<1x128xbf16, #tpu.memory_space<vmem>>, %arg10: memref<128x128xbf16, #tpu.memory_space<vmem>>, %arg11: memref<1x128xf32, #tpu.memory_space<vmem>>, %arg12: memref<160x128xf32, #tpu.memory_space<vmem>>) attributes {dimension_semantics = [#tpu.dimension_semantics<parallel>], iteration_bounds = array<i64: 2>, scalar_prefetch = 0 : i64, scratch_operands = 0 : i64, tpu.core_type = #tpu.core_type<tc>, window_params = [{transform_indices = @transform_0, window_bounds = array<i64: 160, 16>}, {pipeline_mode = #tpu.pipeline_mode<synchronous>, transform_indices = @transform_1, window_bounds = array<i64: 16, 128>}, {pipeline_mode = #tpu.pipeline_mode<synchronous>, transform_indices = @transform_2, window_bounds = array<i64: 1, 128>}, {pipeline_mode = #tpu.pipeline_mode<synchronous>, transform_indices = @transform_3, window_bounds = array<i64: 1, 128>}, {pipeline_mode = #tpu.pipeline_mode<synchronous>, transform_indices = @transform_4, window_bounds = array<i64: 1, 128>}, {pipeline_mode = #tpu.pipeline_mode<synchronous>, transform_indices = @transform_5, window_bounds = array<i64: 128, 128>}, {pipeline_mode = #tpu.pipeline_mode<synchronous>, transform_indices = @transform_6, window_bounds = array<i64: 1, 128>}, {pipeline_mode = #tpu.pipeline_mode<synchronous>, transform_indices = @transform_7, window_bounds = array<i64: 1, 128>}, {pipeline_mode = #tpu.pipeline_mode<synchronous>, transform_indices = @transform_8, window_bounds = array<i64: 1, 128>}, {pipeline_mode = #tpu.pipeline_mode<synchronous>, transform_indices = @transform_9, window_bounds = array<i64: 128, 128>}, {pipeline_mode = #tpu.pipeline_mode<synchronous>, transform_indices = @transform_10, window_bounds = array<i64: 1, 128>}, {transform_indices = @transform_11, window_bounds = array<i64: 160, 128>}]} {
    %c0 = arith.constant 0 : index
    %c0_0 = arith.constant 0 : index
    %0 = vector.load %arg1[%c0, %c0_0] : memref<160x16xbf16, #tpu.memory_space<vmem>>, vector<160x16xbf16>
    %c0_1 = arith.constant 0 : index
    %c0_2 = arith.constant 0 : index
    %1 = vector.load %arg2[%c0_1, %c0_2] : memref<16x128xbf16, #tpu.memory_space<vmem>>, vector<16x128xbf16>
    %cst = arith.constant dense<0.000000e+00> : vector<160x128xf32>
    %2 = tpu.matmul %0, %1, %cst {dimension_numbers = #tpu.dot_dimension_numbers<[1], [0], [0], [1], [0, 0, 1, 1], [], []>} : vector<160x16xbf16>, vector<16x128xbf16>, vector<160x128xf32> -> vector<160x128xf32>
    %c0_3 = arith.constant 0 : index
    %c0_4 = arith.constant 0 : index
    %3 = vector.load %arg3[%c0_3, %c0_4] : memref<1x128xf32, #tpu.memory_space<vmem>>, vector<1x128xf32>
    %4 = vector.broadcast %3 : vector<1x128xf32> to vector<160x128xf32>
    %5 = arith.addf %2, %4 : vector<160x128xf32>
    %cst_5 = arith.constant dense<0.000000e+00> : vector<160xf32>
    %6 = vector.multi_reduction <add>, %5, %cst_5 [1] : vector<160x128xf32> to vector<160xf32>
    %7 = vector.shape_cast %6 : vector<160xf32> to vector<160x1xf32>
    %cst_6 = arith.constant 3.125000e-02 : f32
    %8 = vector.broadcast %cst_6 : f32 to vector<160x1xf32>
    %9 = arith.mulf %7, %8 : vector<160x1xf32>
    %10 = arith.mulf %5, %5 : vector<160x128xf32>
    %cst_7 = arith.constant dense<0.000000e+00> : vector<160xf32>
    %11 = vector.multi_reduction <add>, %10, %cst_7 [1] : vector<160x128xf32> to vector<160xf32>
    %12 = vector.shape_cast %11 : vector<160xf32> to vector<160x1xf32>
    %cst_8 = arith.constant 3.125000e-02 : f32
    %13 = vector.broadcast %cst_8 : f32 to vector<160x1xf32>
    %14 = arith.mulf %12, %13 : vector<160x1xf32>
    %15 = arith.mulf %9, %9 : vector<160x1xf32>
    %16 = arith.subf %14, %15 : vector<160x1xf32>
    %cst_9 = arith.constant 0.000000e+00 : f32
    %17 = vector.broadcast %cst_9 : f32 to vector<160x1xf32>
    %18 = arith.maximumf %16, %17 : vector<160x1xf32>
    %19 = vector.broadcast %9 : vector<160x1xf32> to vector<160x128xf32>
    %20 = arith.subf %5, %19 : vector<160x128xf32>
    %cst_10 = arith.constant 9.99999974E-6 : f32
    %21 = vector.broadcast %cst_10 : f32 to vector<160x1xf32>
    %22 = arith.addf %18, %21 : vector<160x1xf32>
    %23 = math.rsqrt %22 : vector<160x1xf32>
    %24 = vector.broadcast %23 : vector<160x1xf32> to vector<160x128xf32>
    %25 = arith.mulf %20, %24 : vector<160x128xf32>
    %26 = arith.truncf %25 : vector<160x128xf32> to vector<160x128xbf16>
    %c0_11 = arith.constant 0 : index
    %c0_12 = arith.constant 0 : index
    %27 = vector.load %arg4[%c0_11, %c0_12] : memref<1x128xbf16, #tpu.memory_space<vmem>>, vector<1x128xbf16>
    %28 = vector.broadcast %27 : vector<1x128xbf16> to vector<160x128xbf16>
    %29 = arith.mulf %26, %28 : vector<160x128xbf16>
    %c0_13 = arith.constant 0 : index
    %c0_14 = arith.constant 0 : index
    %30 = vector.load %arg5[%c0_13, %c0_14] : memref<1x128xbf16, #tpu.memory_space<vmem>>, vector<1x128xbf16>
    %31 = vector.broadcast %30 : vector<1x128xbf16> to vector<160x128xbf16>
    %32 = arith.addf %29, %31 : vector<160x128xbf16>
    %cst_15 = arith.constant 0.000000e+00 : bf16
    %33 = vector.broadcast %cst_15 : bf16 to vector<160x128xbf16>
    %34 = arith.maximumf %32, %33 : vector<160x128xbf16>
    %c0_16 = arith.constant 0 : index
    %c0_17 = arith.constant 0 : index
    %35 = vector.load %arg6[%c0_16, %c0_17] : memref<128x128xbf16, #tpu.memory_space<vmem>>, vector<128x128xbf16>
    %cst_18 = arith.constant dense<0.000000e+00> : vector<160x128xf32>
    %36 = tpu.matmul %34, %35, %cst_18 {dimension_numbers = #tpu.dot_dimension_numbers<[1], [0], [0], [1], [0, 0, 1, 1], [], []>} : vector<160x128xbf16>, vector<128x128xbf16>, vector<160x128xf32> -> vector<160x128xf32>
    %c0_19 = arith.constant 0 : index
    %c0_20 = arith.constant 0 : index
    %37 = vector.load %arg7[%c0_19, %c0_20] : memref<1x128xf32, #tpu.memory_space<vmem>>, vector<1x128xf32>
    %38 = vector.broadcast %37 : vector<1x128xf32> to vector<160x128xf32>
    %39 = arith.addf %36, %38 : vector<160x128xf32>
    %cst_21 = arith.constant dense<0.000000e+00> : vector<160xf32>
    %40 = vector.multi_reduction <add>, %39, %cst_21 [1] : vector<160x128xf32> to vector<160xf32>
    %41 = vector.shape_cast %40 : vector<160xf32> to vector<160x1xf32>
    %cst_22 = arith.constant 0.020833334 : f32
    %42 = vector.broadcast %cst_22 : f32 to vector<160x1xf32>
    %43 = arith.mulf %41, %42 : vector<160x1xf32>
    %44 = arith.mulf %39, %39 : vector<160x128xf32>
    %cst_23 = arith.constant dense<0.000000e+00> : vector<160xf32>
    %45 = vector.multi_reduction <add>, %44, %cst_23 [1] : vector<160x128xf32> to vector<160xf32>
    %46 = vector.shape_cast %45 : vector<160xf32> to vector<160x1xf32>
    %cst_24 = arith.constant 0.020833334 : f32
    %47 = vector.broadcast %cst_24 : f32 to vector<160x1xf32>
    %48 = arith.mulf %46, %47 : vector<160x1xf32>
    %49 = arith.mulf %43, %43 : vector<160x1xf32>
    %50 = arith.subf %48, %49 : vector<160x1xf32>
    %cst_25 = arith.constant 0.000000e+00 : f32
    %51 = vector.broadcast %cst_25 : f32 to vector<160x1xf32>
    %52 = arith.maximumf %50, %51 : vector<160x1xf32>
    %53 = vector.broadcast %43 : vector<160x1xf32> to vector<160x128xf32>
    %54 = arith.subf %39, %53 : vector<160x128xf32>
    %cst_26 = arith.constant 9.99999974E-6 : f32
    %55 = vector.broadcast %cst_26 : f32 to vector<160x1xf32>
    %56 = arith.addf %52, %55 : vector<160x1xf32>
    %57 = math.rsqrt %56 : vector<160x1xf32>
    %58 = vector.broadcast %57 : vector<160x1xf32> to vector<160x128xf32>
    %59 = arith.mulf %54, %58 : vector<160x128xf32>
    %60 = arith.truncf %59 : vector<160x128xf32> to vector<160x128xbf16>
    %c0_27 = arith.constant 0 : index
    %c0_28 = arith.constant 0 : index
    %61 = vector.load %arg8[%c0_27, %c0_28] : memref<1x128xbf16, #tpu.memory_space<vmem>>, vector<1x128xbf16>
    %62 = vector.broadcast %61 : vector<1x128xbf16> to vector<160x128xbf16>
    %63 = arith.mulf %60, %62 : vector<160x128xbf16>
    %c0_29 = arith.constant 0 : index
    %c0_30 = arith.constant 0 : index
    %64 = vector.load %arg9[%c0_29, %c0_30] : memref<1x128xbf16, #tpu.memory_space<vmem>>, vector<1x128xbf16>
    %65 = vector.broadcast %64 : vector<1x128xbf16> to vector<160x128xbf16>
    %66 = arith.addf %63, %65 : vector<160x128xbf16>
    %cst_31 = arith.constant 0.000000e+00 : bf16
    %67 = vector.broadcast %cst_31 : bf16 to vector<160x128xbf16>
    %68 = arith.maximumf %66, %67 : vector<160x128xbf16>
    %c0_32 = arith.constant 0 : index
    %c0_33 = arith.constant 0 : index
    %69 = vector.load %arg10[%c0_32, %c0_33] : memref<128x128xbf16, #tpu.memory_space<vmem>>, vector<128x128xbf16>
    %cst_34 = arith.constant dense<0.000000e+00> : vector<160x128xf32>
    %70 = tpu.matmul %68, %69, %cst_34 {dimension_numbers = #tpu.dot_dimension_numbers<[1], [0], [0], [1], [0, 0, 1, 1], [], []>} : vector<160x128xbf16>, vector<128x128xbf16>, vector<160x128xf32> -> vector<160x128xf32>
    %c0_35 = arith.constant 0 : index
    %c0_36 = arith.constant 0 : index
    %71 = vector.load %arg11[%c0_35, %c0_36] : memref<1x128xf32, #tpu.memory_space<vmem>>, vector<1x128xf32>
    %72 = vector.broadcast %71 : vector<1x128xf32> to vector<160x128xf32>
    %73 = arith.addf %70, %72 : vector<160x128xf32>
    %c0_37 = arith.constant 0 : index
    %c0_38 = arith.constant 0 : index
    %74 = vector.load %arg12[%c0_37, %c0_38] : memref<160x128xf32, #tpu.memory_space<vmem>>, vector<160x128xf32>
    tpu.vector_store %arg12[%c0_37, %c0_38], %73 {strides = array<i32>} : memref<160x128xf32, #tpu.memory_space<vmem>>, vector<160x128xf32>,
    return
  }
  func.func @transform_0(%arg0: i32) -> (i32, i32) {
    %c0_i32 = arith.constant 0 : i32
    %c0_i32_0 = arith.constant 0 : i32
    return %arg0, %c0_i32 : i32, i32
  }
  func.func @transform_1(%arg0: i32) -> (i32, i32) {
    %c0_i32 = arith.constant 0 : i32
    %c0_i32_0 = arith.constant 0 : i32
    %c0_i32_1 = arith.constant 0 : i32
    return %c0_i32, %c0_i32_0 : i32, i32
  }
  func.func @transform_2(%arg0: i32) -> (i32, i32) {
    %c0_i32 = arith.constant 0 : i32
    %c0_i32_0 = arith.constant 0 : i32
    %c0_i32_1 = arith.constant 0 : i32
    return %c0_i32, %c0_i32_0 : i32, i32
  }
  func.func @transform_3(%arg0: i32) -> (i32, i32) {
    %c0_i32 = arith.constant 0 : i32
    %c0_i32_0 = arith.constant 0 : i32
    %c0_i32_1 = arith.constant 0 : i32
    return %c0_i32, %c0_i32_0 : i32, i32
  }
  func.func @transform_4(%arg0: i32) -> (i32, i32) {
    %c0_i32 = arith.constant 0 : i32
    %c0_i32_0 = arith.constant 0 : i32
    %c0_i32_1 = arith.constant 0 : i32
    return %c0_i32, %c0_i32_0 : i32, i32
  }
  func.func @transform_5(%arg0: i32) -> (i32, i32) {
    %c0_i32 = arith.constant 0 : i32
    %c0_i32_0 = arith.constant 0 : i32
    %c0_i32_1 = arith.constant 0 : i32
    return %c0_i32, %c0_i32_0 : i32, i32
  }
  func.func @transform_6(%arg0: i32) -> (i32, i32) {
    %c0_i32 = arith.constant 0 : i32
    %c0_i32_0 = arith.constant 0 : i32
    %c0_i32_1 = arith.constant 0 : i32
    return %c0_i32, %c0_i32_0 : i32, i32
  }
  func.func @transform_7(%arg0: i32) -> (i32, i32) {
    %c0_i32 = arith.constant 0 : i32
    %c0_i32_0 = arith.constant 0 : i32
    %c0_i32_1 = arith.constant 0 : i32
    return %c0_i32, %c0_i32_0 : i32, i32
  }
  func.func @transform_8(%arg0: i32) -> (i32, i32) {
    %c0_i32 = arith.constant 0 : i32
    %c0_i32_0 = arith.constant 0 : i32
    %c0_i32_1 = arith.constant 0 : i32
    return %c0_i32, %c0_i32_0 : i32, i32
  }
  func.func @transform_9(%arg0: i32) -> (i32, i32) {
    %c0_i32 = arith.constant 0 : i32
    %c0_i32_0 = arith.constant 0 : i32
    %c0_i32_1 = arith.constant 0 : i32
    return %c0_i32, %c0_i32_0 : i32, i32
  }
  func.func @transform_10(%arg0: i32) -> (i32, i32) {
    %c0_i32 = arith.constant 0 : i32
    %c0_i32_0 = arith.constant 0 : i32
    %c0_i32_1 = arith.constant 0 : i32
    return %c0_i32, %c0_i32_0 : i32, i32
  }
  func.func @transform_11(%arg0: i32) -> (i32, i32) {
    %c0_i32 = arith.constant 0 : i32
    %c0_i32_0 = arith.constant 0 : i32
    return %arg0, %c0_i32 : i32, i32
  }
}

</mosaic_0001>

<bundles_post_ra>
// kernel: mlp_apply_pallas.1
= control target key start
LH: loop header
LB: loop body
LE: loop exit
PB: predicated region body
PF: predicated region fallthrough
CT: control target
= control target key end

     0   :  { %s2113_s17 = smov 0   ;;  %s2805_s0 = inlined_call_operand.vmem [shape: bf16[320,16], index: 0, kind: input, shape index: {}]   ;;  %s2806_s1 = inlined_call_operand.vmem [shape: bf16[16,128], index: 1, kind: input, shape index: {}]   ;;  %s2807_s2 = inlined_call_operand.vmem [shape: f32[1,128], index: 2, kind: input, shape index: {}]   ;;  %s2808_s3 = inlined_call_operand.vmem [shape: bf16[1,128], index: 3, kind: input, shape index: {}]   ;;  %s2809_s4 = inlined_call_operand.vmem [shape: bf16[1,128], index: 4, kind: input, shape index: {}]   ;;  %s2810_s5 = inlined_call_operand.vmem [shape: bf16[128,128], index: 5, kind: input, shape index: {}]   ;;  %s2811_s6 = inlined_call_operand.vmem [shape: f32[1,128], index: 6, kind: input, shape index: {}]   ;;  %s2812_s7 = inlined_call_operand.vmem [shape: bf16[1,128], index: 7, kind: input, shape index: {}]   ;;  %s2813_s8 = inlined_call_operand.vmem [shape: bf16[1,128], index: 8, kind: input, shape index: {}]   ;;  %s2814_s9 = inlined_call_operand.vmem [shape: bf16[128,128], index: 9, kind: input, shape index: {}]   ;;  %s2815_s10 = inlined_call_operand.vmem [shape: f32[1,128], index: 10, kind: input, shape index: {}]   ;;  %s2816_s11 = inlined_call_operand.vmem [shape: f32[320,128], index: 11, kind: output, shape index: {}]  }
   0x1 LB: > { %s1736_s18 = sadd.s32 4294967295, %s2050_s17   ;;  %p1740_p0 = scmp.ge.s32.totalorder %s2050_s17, 1  ;;  %s2050_s17 = sphi %s2113_s17, %s21_s17  }
   0x2   : > { %p338_p1 = scmp.lt.s32.totalorder %s2050_s17, 3 }
   0x4   : > { %p339_p2 = pnand %p1740_p0, %p338_p1 }
   0x5   : > { %s378_s21 = smul.u32 (!%p339_p2), 20, %s1736_s18 }
   0x6   : > { %342 = sbr.rel (%p339_p2) target bundleno = 1050 (0x41a), region = 64 }
   0x7   : > { %p379_p3 = scmp.lt.s32.totalorder (!%p339_p2), %s378_s21, 39 }
   0xb   : > { %v1937_v0 = vld [vmem:[%s2806_s1] sm:$0xff]   ;;  %s2818_s21 = smov (!%p379_p3, %s378_s21), 39  ;;  %vm476_vm0 = vcmask 130048   ;;  %v1948_v44 = vld [vmem:[%s2810_s5 + $0x38] sm:$0xff]   ;;  %v1949_v48 = vld [vmem:[%s2810_s5 + $0x30] sm:$0xff]  }
   0xc   : > { %1832 = vmatprep.subr.bf16.mxu0 %v1937_v0  ;;  %1926 = vmatprep.subr.bf16.mxu1 %v1937_v0  ;;  %s1741_s22 = sshll.u32 %s2818_s21, 2  ;;  %v2143_v11 = vld [vmem:[%s2807_s2] ss:$0 sm:$0xff]  ;;  %v1950_v52 = vld [vmem:[%s2810_s5 + $0x28] sm:$0xff]   ;;  %v1952_v60 = vld [vmem:[%s2810_s5 + $0x18] sm:$0xff]   ;;  %s1742_s18 = sshll.u32 %s2818_s21, 3 }
   0xd   : > { %1833 = vmatpush3.bf16.msra.mxu0 %v1937_v0  ;;  %1927 = vmatpush3.bf16.msra.mxu1 %v1937_v0  ;;  %s382_s25 = scalar_lea.vmem %s2805_s0, %s1741_s22  ;;  %v1951_v56 = vld [vmem:[%s2810_s5 + $0x20] sm:$0xff]   ;;  %v1953_v0 = vld [vmem:[%s2810_s5 + $0x10] sm:$0xff]   ;;  %s2780_s24 = scalar_lea.vmem %s2816_s11, %s1742_s18 }
   0xe   : > { %v1938_v1 = vld [vmem:[%s382_s25] sm:$0xff]   ;;  %v1939_v2 = vld [vmem:[%s382_s25 + $0x8] sm:$0xff]   ;;  %v1942_v5 = vld [vmem:[%s382_s25 + $0x10] sm:$0xff]   ;;  %1854 = vmatprep.subr.bf16.mxu1 %v1948_v44 }
   0xf   : > { %1834 = vmatprep.mubr.msk.bf16.mxu0 %vm476_vm0, %v1938_v1  ;;  %v1940_v3 = vld [vmem:[%s382_s25 + $0x40] sm:$0xff]   ;;  %v1941_v4 = vld [vmem:[%s382_s25 + $0x48] sm:$0xff]   ;;  %v1943_v6 = vld [vmem:[%s382_s25 + $0x18] sm:$0xff]  }
  0x10   : > { %1835 = vmatmul.mubr.msk.bf16.vlgmr.msra.gmra.mxu0 %vm476_vm0, %v1939_v2  ;;  %1850 = vmatprep.mubr.msk.bf16.mxu1 %vm476_vm0, %v1940_v3  ;;  %v1944_v7 = vld [vmem:[%s382_s25 + $0x20] sm:$0xff]   ;;  %v1945_v8 = vld [vmem:[%s382_s25 + $0x28] sm:$0xff]   ;;  %v1946_v9 = vld [vmem:[%s382_s25 + $0x30] sm:$0xff]  }
  0x11   : > { %1851 = vmatmul.mubr.msk.bf16.vlgmr.msra.gmra.mxu1 %vm476_vm0, %v1941_v4  ;;  %1838 = vmatprep.mubr.msk.bf16.mxu0 %vm476_vm0, %v1942_v5  ;;  %v1947_v10 = vld [vmem:[%s382_s25 + $0x38] sm:$0xff]   ;;  %v1954_v4 = vld [vmem:[%s2810_s5 + $0x8] sm:$0xff]  }
  0x12   : > { %1855 = vmatpush3.bf16.msra.mxu1 %v1948_v44 }
  0x13   : > { %1856 = vmatprep.subr.bf16.mxu1 %v1949_v48 }
  0x16   : > { %1857 = vmatpush3.bf16.msra.mxu1 %v1949_v48 }
  0x17   : > { %1858 = vmatprep.subr.bf16.mxu1 %v1950_v52 }
  0x18   : > { %1839 = vmatmul.mubr.msk.bf16.gmra.mxu0 %vm476_vm0, %v1943_v6 }
  0x19   : > { %1842 = vmatprep.mubr.msk.bf16.mxu0 %vm476_vm0, %v1944_v7  ;;  %v1955_v7 = vld [vmem:[%s2810_s5] sm:$0xff]  }
  0x1a   : > { %1859 = vmatpush3.bf16.msra.mxu1 %v1950_v52 }
  0x1b   : > { %1860 = vmatprep.subr.bf16.mxu1 %v1951_v56 }
  0x1e   : > { %1861 = vmatpush3.bf16.msra.mxu1 %v1951_v56 }
  0x1f   : > { %1862 = vmatprep.subr.bf16.mxu1 %v1952_v60 }
  0x20   : > { %1843 = vmatmul.mubr.msk.bf16.gmra.mxu0 %vm476_vm0, %v1945_v8 }
  0x21   : > { %1846 = vmatprep.mubr.msk.bf16.mxu0 %vm476_vm0, %v1946_v9 }
  0x22   : > { %1863 = vmatpush3.bf16.msra.mxu1 %v1952_v60 }
  0x23   : > { %1864 = vmatprep.subr.bf16.mxu1 %v1953_v0 }
  0x26   : > { %1865 = vmatpush3.bf16.msra.mxu1 %v1953_v0 }
  0x27   : > { %1866 = vmatprep.subr.bf16.mxu1 %v1954_v4 }
  0x28   : > { %1847 = vmatmul.mubr.msk.bf16.gmra.mxu0 %vm476_vm0, %v1947_v10 }
  0x2a   : > { %1867 = vmatpush3.bf16.msra.mxu1 %v1954_v4 }
  0x2b   : > { %1868 = vmatprep.subr.bf16.mxu1 %v1955_v7 }
  0x2e   : > { %1869 = vmatpush3.bf16.msra.mxu1 %v1955_v7 }
  0xd0   : > { %v1836_v12 = vpop.f32.mrf.mxu0 }
  0xd1   : > { %v2146_v13 = vadd.f32 %v1836_v12, %v2143_v11  ;;  %v1852_v15 = vpop.f32.mrf.mxu1 }
  0xd2   : > { %v541_v14 = vpop.f32.mrf.mxu0  ;;  %v2152_v17 = vadd.f32 %v1852_v15, %v2143_v11 }
  0xd3   : > { %v2149_v16 = vadd.f32 %v2143_v11, %v541_v14  ;;  %624 = vadd.xlane.f32.xlu1 %v2146_v13  ;;  %v605_v19 = vpop.f32.mrf.mxu1  ;;  %v682_v22 = vmul.f32 %v2146_v13, %v2146_v13 }
  0xd4   : > { %v1837_v18 = vpop.f32.mrf.mxu0  ;;  %v2167_v27 = vadd.f32 %v2143_v11, %v605_v19 }
  0xd5   : > { %v2156_v20 = vadd.f32 %v1837_v18, %v2143_v11  ;;  %620 = vadd.xlane.f32.xlu0 %v2149_v16  ;;  %v2159_v21 = vpop.f32.mrf.mxu1  ;;  %v680_v31 = vmul.f32 %v2149_v16, %v2149_v16 }
  0xd6   : > { %v544_v23 = vpop.f32.mrf.mxu0  ;;  %v2280_v12 = vadd.f32 %v2159_v21, %v2143_v11  ;;  %v696_v15 = vmul.f32 %v2167_v27, %v2167_v27 }
  0xd7   : > { %626 = vadd.xlane.f32.xlu1 %v2156_v20  ;;  %v683_v24 = vmul.f32 %v2156_v20, %v2156_v20  ;;  %v608_v25 = vpop.f32.mrf.mxu1  ;;  %v2170_v28 = vadd.f32 %v2143_v11, %v544_v23 }
  0xd8   : > { %v1840_v26 = vpop.f32.mrf.mxu0  ;;  %v2173_v29 = vadd.f32 %v2143_v11, %v608_v25  ;;  %v699_v18 = vmul.f32 %v2280_v12, %v2280_v12 }
  0xd9   : > { %704 = vadd.xlane.f32.xlu0 %v682_v22  ;;  %v681_v32 = vmul.f32 %v2170_v28, %v2170_v28  ;;  %v2186_v36 = vadd.f32 %v1840_v26, %v2143_v11 }
  0xda   : > { %v557_v30 = vpop.f32.mrf.mxu0  ;;  %v697_v14 = vmul.f32 %v2173_v29, %v2173_v29 }
  0xdb   : > { %706 = vadd.xlane.f32.xlu1 %v683_v24  ;;  %v2194_v39 = vadd.f32 %v2143_v11, %v557_v30  ;;  %v686_v42 = vmul.f32 %v2186_v36, %v2186_v36 }
  0xdc   : > { %v1841_v33 = vpop.f32.mrf.mxu0 }
  0xdd   : > { %652 = vadd.xlane.f32.xlu0 %v2167_v27  ;;  %v2182_v34 = vadd.f32 %v1841_v33, %v2143_v11  ;;  %v684_v47 = vmul.f32 %v2194_v39, %v2194_v39 }
  0xde   : > { %v560_v35 = vpop.f32.mrf.mxu0 }
  0xdf   : > { %654 = vadd.xlane.f32.xlu1 %v2173_v29  ;;  %v2190_v37 = vadd.f32 %v2143_v11, %v560_v35  ;;  %v687_v40 = vmul.f32 %v2182_v34, %v2182_v34 }
  0xe0   : > { %v1844_v38 = vpop.f32.mrf.mxu0 }
  0xe1   : > { %700 = vadd.xlane.f32.xlu0 %v680_v31  ;;  %v685_v43 = vmul.f32 %v2190_v37, %v2190_v37  ;;  %v2216_v50 = vadd.f32 %v1844_v38, %v2143_v11 }
  0xe2   : > { %v573_v41 = vpop.f32.mrf.mxu0 }
  0xe3   : > { %702 = vadd.xlane.f32.xlu1 %v681_v32  ;;  %v2227_v54 = vadd.f32 %v2143_v11, %v573_v41  ;;  %v690_v58 = vmul.f32 %v2216_v50, %v2216_v50 }
  0xe4   : > { %v1845_v45 = vpop.f32.mrf.mxu0 }
  0xe5   : > { %622 = vadd.xlane.f32.xlu0 %v2170_v28  ;;  %v2208_v46 = vadd.f32 %v1845_v45, %v2143_v11  ;;  %v688_v63 = vmul.f32 %v2227_v54, %v2227_v54 }
  0xe6   : > { %v576_v49 = vpop.f32.mrf.mxu0 }
  0xe7   : > { %634 = vadd.xlane.f32.xlu1 %v2182_v34  ;;  %v2220_v51 = vadd.f32 %v2143_v11, %v576_v49  ;;  %v691_v55 = vmul.f32 %v2208_v46, %v2208_v46 }
  0xe8   : > { %v1848_v53 = vpop.f32.mrf.mxu0 }
  0xe9   : > { %632 = vadd.xlane.f32.xlu0 %v2186_v36  ;;  %v689_v59 = vmul.f32 %v2220_v51, %v2220_v51  ;;  %v2252_v2 = vadd.f32 %v1848_v53, %v2143_v11 }
  0xea   : > { %v589_v57 = vpop.f32.mrf.mxu0 }
  0xeb   : > { %630 = vadd.xlane.f32.xlu1 %v2190_v37  ;;  %v2263_v5 = vadd.f32 %v2143_v11, %v589_v57  ;;  %v694_v8 = vmul.f32 %v2252_v2, %v2252_v2 }
  0xec   : > { %v1849_v61 = vpop.f32.mrf.mxu0 }
  0xed   : > { %628 = vadd.xlane.f32.xlu0 %v2194_v39  ;;  %v2244_v62 = vadd.f32 %v1849_v61, %v2143_v11  ;;  %v692_v10 = vmul.f32 %v2263_v5, %v2263_v5 }
  0xee   : > { %v592_v1 = vpop.f32.mrf.mxu0 }
  0xef   : > { %714 = vadd.xlane.f32.xlu1 %v687_v40  ;;  %v2256_v3 = vadd.f32 %v2143_v11, %v592_v1  ;;  %v695_v6 = vmul.f32 %v2244_v62, %v2244_v62  ;;  %v698_v11 = vmul.f32 %v2152_v17, %v2152_v17 }
  0xf1   : > { %712 = vadd.xlane.f32.xlu0 %v686_v42  ;;  %v693_v9 = vmul.f32 %v2256_v3, %v2256_v3 }
  0xf3   : > { %710 = vadd.xlane.f32.xlu1 %v685_v43 }
  0xf5   : > { %708 = vadd.xlane.f32.xlu0 %v684_v47 }
  0xf7   : > { %642 = vadd.xlane.f32.xlu1 %v2208_v46 }
  0xf9   : > { %640 = vadd.xlane.f32.xlu0 %v2216_v50 }
  0xfb   : > { %638 = vadd.xlane.f32.xlu1 %v2220_v51 }
  0xfd   : > { %636 = vadd.xlane.f32.xlu0 %v2227_v54 }
  0xff   : > { %722 = vadd.xlane.f32.xlu1 %v691_v55 }
 0x101   : > { %720 = vadd.xlane.f32.xlu0 %v690_v58 }
 0x103   : > { %718 = vadd.xlane.f32.xlu1 %v689_v59 }
 0x105   : > { %716 = vadd.xlane.f32.xlu0 %v688_v63 }
 0x107   : > { %650 = vadd.xlane.f32.xlu1 %v2244_v62 }
 0x109   : > { %648 = vadd.xlane.f32.xlu0 %v2252_v2 }
 0x10b   : > { %646 = vadd.xlane.f32.xlu1 %v2256_v3 }
 0x10d   : > { %644 = vadd.xlane.f32.xlu0 %v2263_v5 }
 0x10f   : > { %730 = vadd.xlane.f32.xlu1 %v695_v6 }
 0x111   : > { %728 = vadd.xlane.f32.xlu0 %v694_v8 }
 0x113   : > { %726 = vadd.xlane.f32.xlu1 %v693_v9 }
 0x115   : > { %724 = vadd.xlane.f32.xlu0 %v692_v10 }
 0x117   : > { %658 = vadd.xlane.f32.xlu1 %v2280_v12 }
 0x119   : > { %656 = vadd.xlane.f32.xlu0 %v2152_v17 }
 0x11b   : > { %734 = vadd.xlane.f32.xlu1 %v697_v14 }
 0x11d   : > { %732 = vadd.xlane.f32.xlu0 %v696_v15  ;;  %v914_v15 = vlaneseq }
 0x11f   : > { %738 = vadd.xlane.f32.xlu1 %v699_v18 }
 0x121   : > { %736 = vadd.xlane.f32.xlu0 %v698_v11 }
 0x15c   : > { %v625_v19 = vpop.xlane.xlu1 %624 }
 0x15d   : > { %v2292_v22 = vmul.f32 0.03125, %v625_v19 }
 0x15e   : > { %v621_v21 = vpop.xlane.xlu0 %620 }
 0x15f   : > { %v762_v30 = vmul.f32 %v2292_v22, %v2292_v22  ;;  %v2302_v40 = vmul.f32 0.03125, %v621_v21 }
 0x160   : > { %v627_v23 = vpop.xlane.xlu1 %626 }
 0x161   : > { %v2294_v24 = vmul.f32 0.03125, %v627_v23  ;;  %v760_v47 = vmul.f32 %v2302_v40, %v2302_v40 }
 0x162   : > { %v705_v25 = vpop.xlane.xlu0 %704 }
 0x163   : > { %v742_v26 = vmul.f32 0.03125, %v705_v25  ;;  %v763_v32 = vmul.f32 %v2294_v24, %v2294_v24 }
 0x164   : > { %v707_v31 = vpop.xlane.xlu1 %706 }
 0x165   : > { %v743_v33 = vmul.f32 0.03125, %v707_v31  ;;  %v782_v35 = vsub.f32 %v742_v26, %v762_v30  ;;  %v910_v30 = vld [vmem:[%s2808_s3] sm:$0x1] }
 0x166   : > { %v2300_v38 = vpop.xlane.xlu0 %652 }
 0x167   : > { %v783_v41 = vsub.f32 %v743_v33, %v763_v32  ;;  %v802_v44 = vmax.f32 %v782_v35, 0.0  ;;  %v915_v33 = vshrl.u32 %v914_v15, 7 }
 0x168   : > { %v2304_v42 = vpop.xlane.xlu1 %654 }
 0x169   : > { %v803_v43 = vmax.f32 %v783_v41, 0.0  ;;  %v842_v55 = vadd.f32 1e-05, %v802_v44 }
 0x16a   : > { %v701_v45 = vpop.xlane.xlu0 %700 }
 0x16b   : > { %v740_v48 = vmul.f32 0.03125, %v701_v45  ;;  %v843_v49 = vadd.f32 1e-05, %v803_v43 }
 0x16c   : > { %v703_v52 = vpop.xlane.xlu1 %702 }
 0x16d   : > { %v780_v53 = vsub.f32 %v740_v48, %v760_v47  ;;  %1964 = vrsqrt.f32 %v843_v49  ;;  %v741_v60 = vmul.f32 0.03125, %v703_v52  ;;  %v823_v47 = vsub.f32 %v2156_v20, %v2294_v24  ;;  %v928_v20 = vld [vmem:[%s2809_s4] sm:$0x1] }
 0x16e   : > { %v623_v56 = vpop.xlane.xlu0 %622  ;;  %1966 = vrsqrt.f32 %v842_v55  ;;  %v912_v49 = vpack.i.b16 %v910_v30, %v910_v30 }
 0x16f   : > { %v800_v57 = vmax.f32 %v780_v53, 0.0  ;;  %v2308_v58 = vmul.f32 0.03125, %v623_v56 }
 0x170   : > { %v635_v59 = vpop.xlane.xlu1 %634 }
 0x171   : > { %v761_v61 = vmul.f32 %v2308_v58, %v2308_v58  ;;  %v840_v0 = vadd.f32 1e-05, %v800_v57  ;;  %v2312_v7 = vmul.f32 0.03125, %v635_v59  ;;  %v822_v59 = vsub.f32 %v2146_v13, %v2292_v22 }
 0x172   : > { %v633_v63 = vpop.xlane.xlu0 %632 }
 0x173   : > { %v781_v1 = vsub.f32 %v741_v60, %v761_v61  ;;  %1968 = vrsqrt.f32 %v840_v0  ;;  %v2314_v10 = vmul.f32 0.03125, %v633_v63  ;;  %v767_v18 = vmul.f32 %v2312_v7, %v2312_v7 }
 0x174   : > { %v631_v4 = vpop.xlane.xlu1 %630  ;;  %v2335_v63 = vsub.s32 0, %v915_v33 }
 0x175   : > { %v801_v6 = vmax.f32 %v781_v1, 0.0  ;;  %v2318_v11 = vmul.f32 0.03125, %v631_v4  ;;  %v766_v23 = vmul.f32 %v2314_v10, %v2314_v10 }
 0x176   : > { %v629_v8 = vpop.xlane.xlu0 %628  ;;  %v2341_v15 = vrot.slane %v912_v49, %v2335_v63 }
 0x177   : > { %v841_v9 = vadd.f32 1e-05, %v801_v6  ;;  %v2325_v31 = vmul.f32 0.03125, %v629_v8  ;;  %v765_v41 = vmul.f32 %v2318_v11, %v2318_v11 }
 0x178   : > { %v715_v14 = vpop.xlane.xlu1 %714 }
 0x179   : > { %1970 = vrsqrt.f32 %v841_v9  ;;  %v747_v19 = vmul.f32 0.03125, %v715_v14  ;;  %v764_v60 = vmul.f32 %v2325_v31, %v2325_v31 }
 0x17a   : > { %v713_v21 = vpop.xlane.xlu0 %712  ;;  %v1965_v35 = vpop.eup %1964 }
 0x17b   : > { %v787_v25 = vsub.f32 %v747_v19, %v767_v18  ;;  %v746_v26 = vmul.f32 0.03125, %v713_v21  ;;  %v1967_v52 = vpop.eup %1966  ;;  %v883_v0 = vmul.f32 %v1965_v35, %v823_v47  ;;  %v930_v18 = vpack.i.b16 %v928_v20, %v928_v20 }
 0x17c   : > { %v711_v32 = vpop.xlane.xlu1 %710  ;;  %v882_v8 = vmul.f32 %v1967_v52, %v822_v59  ;;  %v820_v21 = vsub.f32 %v2149_v16, %v2302_v40 }
 0x17d   : > { %v807_v43 = vmax.f32 %v787_v25, 0.0  ;;  %v786_v44 = vsub.f32 %v746_v26, %v766_v23  ;;  %v745_v45 = vmul.f32 0.03125, %v711_v32  ;;  %v821_v23 = vsub.f32 %v2170_v28, %v2308_v58 }
 0x17e   : > { %v709_v48 = vpop.xlane.xlu0 %708  ;;  %v901_v19 = vpack.c.bf16 %v883_v0, %v882_v8 }
 0x17f   : > { %v847_v53 = vadd.f32 1e-05, %v807_v43  ;;  %v806_v55 = vmax.f32 %v786_v44, 0.0  ;;  %v785_v56 = vsub.f32 %v745_v45, %v765_v41  ;;  %v744_v57 = vmul.f32 0.03125, %v709_v48 }
 0x180   : > { %v643_v61 = vpop.xlane.xlu1 %642  ;;  %v1969_v13 = vpop.eup %1968  ;;  %v2354_v45 = vrot.slane %v930_v18, %v2335_v63  ;;  %v919_v16 = vmul.bf16 %v2341_v15, %v901_v19  ;;  %v826_v18 = vsub.f32 %v2186_v36, %v2314_v10  ;;  %v825_v36 = vsub.f32 %v2190_v37, %v2318_v11 }
 0x181   : > { %v846_v1 = vadd.f32 1e-05, %v806_v55  ;;  %v805_v4 = vmax.f32 %v785_v56, 0.0  ;;  %1972 = vrsqrt.f32 %v847_v53  ;;  %v784_v24 = vsub.f32 %v744_v57, %v764_v60 }
 0x182   : > { %v641_v6 = vpop.xlane.xlu0 %640  ;;  %v2347_v25 = vmul.f32 0.03125, %v643_v61  ;;  %v880_v33 = vmul.f32 %v1969_v13, %v820_v21  ;;  %v937_v59 = vadd.bf16 %v2354_v45, %v919_v16  ;;  %v2052_v21 = vmov 0  }
 0x183   : > { %1974 = vrsqrt.f32 %v846_v1  ;;  %v845_v9 = vadd.f32 1e-05, %v805_v4  ;;  %v804_v22 = vmax.f32 %v784_v24, 0.0  ;;  %v2349_v41 = vmul.f32 0.03125, %v641_v6 }
 0x184   : > { %v639_v14 = vpop.xlane.xlu1 %638  ;;  %v771_v40 = vmul.f32 %v2347_v25, %v2347_v25  ;;  %v824_v10 = vsub.f32 %v2194_v39, %v2325_v31 }
 0x185   : > { %1976 = vrsqrt.f32 %v845_v9  ;;  %v844_v30 = vadd.f32 1e-05, %v804_v22  ;;  %v2351_v43 = vmul.f32 0.03125, %v639_v14  ;;  %v770_v49 = vmul.f32 %v2349_v41, %v2349_v41 }
 0x186   : > { %v1971_v26 = vpop.eup %1970  ;;  %v637_v32 = vpop.xlane.xlu0 %636  ;;  %v827_v14 = vsub.f32 %v2182_v34, %v2312_v7 }
 0x187   : > { %v881_v35 = vmul.f32 %v1971_v26, %v821_v23  ;;  %1978 = vrsqrt.f32 %v844_v30  ;;  %v2359_v47 = vmul.f32 0.03125, %v637_v32  ;;  %v769_v56 = vmul.f32 %v2351_v43, %v2351_v43 }
 0x188   : > { %v723_v44 = vpop.xlane.xlu1 %722 }
 0x189   : > { %v900_v28 = vpack.c.bf16 %v881_v35, %v880_v33  ;;  %v751_v58 = vmul.f32 0.03125, %v723_v44  ;;  %v768_v4 = vmul.f32 %v2359_v47, %v2359_v47  ;;  %v947_v33 = vmax.bf16 %v2052_v21, %v937_v59 }
 0x18a   : > { %v721_v48 = vpop.xlane.xlu0 %720 }
 0x18b   : > { %v791_v52 = vsub.f32 %v751_v58, %v771_v40  ;;  %v750_v53 = vmul.f32 0.03125, %v721_v48  ;;  %v918_v55 = vmul.bf16 %v2341_v15, %v900_v28 }
 0x18c   : > { %v719_v57 = vpop.xlane.xlu1 %718 }
 0x18d   : > { %v811_v60 = vmax.f32 %v791_v52, 0.0  ;;  %v790_v61 = vsub.f32 %v750_v53, %v770_v49  ;;  %v749_v0 = vmul.f32 0.03125, %v719_v57  ;;  %v936_v1 = vadd.bf16 %v2354_v45, %v918_v55 }
 0x18e   : > { %v717_v20 = vpop.xlane.xlu0 %716  ;;  %v1973_v24 = vpop.eup %1972 }
 0x18f   : > { %v851_v6 = vadd.f32 1e-05, %v811_v60  ;;  %v810_v8 = vmax.f32 %v790_v61, 0.0  ;;  %v789_v9 = vsub.f32 %v749_v0, %v769_v56  ;;  %v748_v13 = vmul.f32 0.03125, %v717_v20 }
 0x190   : > { %v1975_v22 = vpop.eup %1974  ;;  %v651_v19 = vpop.xlane.xlu1 %650  ;;  %v946_v23 = vmax.bf16 %v2052_v21, %v936_v1  ;;  %v887_v16 = vmul.f32 %v1973_v24, %v827_v14 }
 0x191   : > { %v850_v26 = vadd.f32 1e-05, %v810_v8  ;;  %v809_v30 = vmax.f32 %v789_v9, 0.0  ;;  %v788_v32 = vsub.f32 %v748_v13, %v768_v4  ;;  %1980 = vrsqrt.f32 %v851_v6 }
 0x192   : > { %1870 = vmatprep.mubr.bf16.mxu1 %v946_v23  ;;  %v649_v35 = vpop.xlane.xlu0 %648  ;;  %v886_v44 = vmul.f32 %v1975_v22, %v826_v18  ;;  %v1977_v28 = vpop.eup %1976  ;;  %v2380_v52 = vmul.f32 0.03125, %v651_v19 }
 0x193   : > { %1982 = vrsqrt.f32 %v850_v26  ;;  %v849_v34 = vadd.f32 1e-05, %v809_v30  ;;  %v808_v7 = vmax.f32 %v788_v32, 0.0  ;;  %1871 = vmatmul.mubr.bf16.vlgmr.msra.gmra.mxu1 %v947_v33  ;;  %v885_v56 = vmul.f32 %v1977_v28, %v825_v36 }
 0x194   : > { %v647_v40 = vpop.xlane.xlu1 %646  ;;  %v903_v58 = vpack.c.bf16 %v887_v16, %v886_v44  ;;  %v1979_v48 = vpop.eup %1978  ;;  %v2383_v59 = vmul.f32 0.03125, %v649_v35  ;;  %v775_v39 = vmul.f32 %v2380_v52, %v2380_v52  ;;  %v830_v36 = vsub.f32 %v2216_v50, %v2349_v41 }
 0x195   : > { %v848_v49 = vadd.f32 1e-05, %v808_v7  ;;  %1984 = vrsqrt.f32 %v849_v34  ;;  %v884_v55 = vmul.f32 %v1979_v48, %v824_v10  ;;  %v2387_v11 = vmul.f32 0.03125, %v647_v40 }
 0x196   : > { %v645_v53 = vpop.xlane.xlu0 %644  ;;  %v921_v57 = vmul.bf16 %v2341_v15, %v903_v58  ;;  %v774_v20 = vmul.f32 %v2383_v59, %v2383_v59  ;;  %v2403_v34 = vmul.f32 0.03125, %v2304_v42  ;;  %v831_v7 = vsub.f32 %v2208_v46, %v2347_v25 }
 0x197   : > { %1986 = vrsqrt.f32 %v848_v49  ;;  %v902_v37 = vpack.c.bf16 %v885_v56, %v884_v55  ;;  %v2389_v61 = vmul.f32 0.03125, %v645_v53  ;;  %v773_v13 = vmul.f32 %v2387_v11, %v2387_v11 }
 0x198   : > { %v731_v60 = vpop.xlane.xlu1 %730  ;;  %v939_v4 = vadd.bf16 %v2354_v45, %v921_v57  ;;  %v2410_v42 = vmul.f32 0.03125, %v2300_v38  ;;  %v829_v50 = vsub.f32 %v2220_v51, %v2351_v43  ;;  %v828_v41 = vsub.f32 %v2227_v54, %v2359_v47 }
 0x199   : > { %v755_v31 = vmul.f32 0.03125, %v731_v60  ;;  %v920_v1 = vmul.bf16 %v2341_v15, %v902_v37  ;;  %v772_v19 = vmul.f32 %v2389_v61, %v2389_v61 }
 0x19a   : > { %v729_v0 = vpop.xlane.xlu0 %728  ;;  %v949_v30 = vmax.bf16 %v2052_v21, %v939_v4  ;;  %v776_v51 = vmul.f32 %v2410_v42, %v2410_v42 }
 0x19b   : > { %v795_v24 = vsub.f32 %v755_v31, %v775_v39  ;;  %v754_v6 = vmul.f32 0.03125, %v729_v0  ;;  %v938_v9 = vadd.bf16 %v2354_v45, %v920_v1  ;;  %v777_v39 = vmul.f32 %v2403_v34, %v2403_v34 }
 0x19c   : > { %v727_v8 = vpop.xlane.xlu1 %726 }
 0x19d   : > { %v815_v22 = vmax.f32 %v795_v24, 0.0  ;;  %v794_v14 = vsub.f32 %v754_v6, %v774_v20  ;;  %v753_v18 = vmul.f32 0.03125, %v727_v8  ;;  %v948_v26 = vmax.bf16 %v2052_v21, %v938_v9 }
 0x19e   : > { %v725_v23 = vpop.xlane.xlu0 %724  ;;  %v1981_v32 = vpop.eup %1980 }
 0x19f   : > { %v855_v33 = vadd.f32 1e-05, %v815_v22  ;;  %v814_v35 = vmax.f32 %v794_v14, 0.0  ;;  %v793_v44 = vsub.f32 %v753_v18, %v773_v13  ;;  %v752_v16 = vmul.f32 0.03125, %v725_v23  ;;  %1874 = vmatprep.mubr.bf16.mxu1 %v948_v26 }
 0x1a0   : > { %v1983_v28 = vpop.eup %1982  ;;  %v659_v10 = vpop.xlane.xlu1 %658  ;;  %1875 = vmatmul.mubr.bf16.gmra.mxu1 %v949_v30  ;;  %v891_v55 = vmul.f32 %v1981_v32, %v831_v7 }
 0x1a1   : > { %1988 = vrsqrt.f32 %v855_v33  ;;  %v854_v40 = vadd.f32 1e-05, %v814_v35  ;;  %v813_v58 = vmax.f32 %v793_v44, 0.0  ;;  %v792_v48 = vsub.f32 %v752_v16, %v772_v19 }
 0x1a2   : > { %v657_v49 = vpop.xlane.xlu0 %656  ;;  %v890_v53 = vmul.f32 %v1983_v28, %v830_v36  ;;  %v1985_v56 = vpop.eup %1984  ;;  %v2418_v0 = vmul.f32 0.03125, %v659_v10  ;;  %v835_v10 = vsub.f32 %v2244_v62, %v2380_v52  ;;  %v833_v62 = vsub.f32 %v2256_v3, %v2387_v11 }
 0x1a3   : > { %1990 = vrsqrt.f32 %v854_v40  ;;  %v853_v57 = vadd.f32 1e-05, %v813_v58  ;;  %v812_v46 = vmax.f32 %v792_v48, 0.0  ;;  %v2420_v38 = vmul.f32 0.03125, %v657_v49 }
 0x1a4   : > { %v1987_v25 = vpop.eup %1986  ;;  %v735_v60 = vpop.xlane.xlu1 %734  ;;  %v905_v37 = vpack.c.bf16 %v891_v55, %v890_v53  ;;  %v889_v24 = vmul.f32 %v1985_v56, %v829_v50  ;;  %v779_v9 = vmul.f32 %v2418_v0, %v2418_v0  ;;  %v834_v40 = vsub.f32 %v2252_v2, %v2383_v59 }
 0x1a5   : > { %1992 = vrsqrt.f32 %v853_v57  ;;  %v852_v31 = vadd.f32 1e-05, %v812_v46  ;;  %v757_v1 = vmul.f32 0.03125, %v735_v60  ;;  %v888_v20 = vmul.f32 %v1987_v25, %v828_v41 }
 0x1a6   : > { %v733_v4 = vpop.xlane.xlu0 %732  ;;  %v923_v43 = vmul.bf16 %v2341_v15, %v905_v37  ;;  %v778_v14 = vmul.f32 %v2420_v38, %v2420_v38  ;;  %v832_v2 = vsub.f32 %v2263_v5, %v2389_v61  ;;  %v837_v3 = vsub.f32 %v2173_v29, %v2403_v34 }
 0x1a7   : > { %1994 = vrsqrt.f32 %v852_v31  ;;  %v756_v54 = vmul.f32 0.03125, %v733_v4  ;;  %v797_v47 = vsub.f32 %v757_v1, %v777_v39  ;;  %v904_v8 = vpack.c.bf16 %v889_v24, %v888_v20 }
 0x1a8   : > { %v739_v6 = vpop.xlane.xlu1 %738  ;;  %v941_v33 = vadd.bf16 %v2354_v45, %v923_v43  ;;  %v836_v4 = vsub.f32 %v2167_v27, %v2410_v42  ;;  %v839_v43 = vsub.f32 %v2280_v12, %v2418_v0  ;;  %v2465_v0 = vld [vmem:[%s2811_s6] ss:$0 sm:$0xff] }
 0x1a9   : > { %v796_v13 = vsub.f32 %v756_v54, %v776_v51  ;;  %v759_v22 = vmul.f32 0.03125, %v739_v6  ;;  %v817_v18 = vmax.f32 %v797_v47, 0.0  ;;  %v922_v23 = vmul.bf16 %v2341_v15, %v904_v8 }
 0x1aa   : > { %v737_v19 = vpop.xlane.xlu0 %736  ;;  %v951_v53 = vmax.bf16 %v2052_v21, %v941_v33  ;;  %v838_v47 = vsub.f32 %v2152_v17, %v2420_v38 }
 0x1ab   : > { %v816_v26 = vmax.f32 %v796_v13, 0.0  ;;  %v799_v30 = vsub.f32 %v759_v22, %v779_v9  ;;  %v758_v32 = vmul.f32 0.03125, %v737_v19  ;;  %v857_v35 = vadd.f32 1e-05, %v817_v18 }
 0x1ac   : > { %v940_v44 = vadd.bf16 %v2354_v45, %v922_v23 }
 0x1ad   : > { %v856_v16 = vadd.f32 1e-05, %v816_v26  ;;  %v819_v28 = vmax.f32 %v799_v30, 0.0  ;;  %v798_v7 = vsub.f32 %v758_v32, %v778_v14  ;;  %1996 = vrsqrt.f32 %v857_v35 }
 0x1ae   : > { %v1989_v36 = vpop.eup %1988  ;;  %v950_v58 = vmax.bf16 %v2052_v21, %v940_v44 }
 0x1af   : > { %1998 = vrsqrt.f32 %v856_v16  ;;  %v859_v48 = vadd.f32 1e-05, %v819_v28  ;;  %v818_v49 = vmax.f32 %v798_v7, 0.0  ;;  %v895_v46 = vmul.f32 %v1989_v36, %v835_v10 }
 0x1b0   : > { %v1991_v55 = vpop.eup %1990  ;;  %1878 = vmatprep.mubr.bf16.mxu1 %v950_v58 }
 0x1b1   : > { %2000 = vrsqrt.f32 %v859_v48  ;;  %v858_v56 = vadd.f32 1e-05, %v818_v49  ;;  %1879 = vmatmul.mubr.bf16.gmra.mxu1 %v951_v53  ;;  %v894_v57 = vmul.f32 %v1991_v55, %v834_v40  ;;  %v1956_v55 = vld [vmem:[%s2814_s9 + $0x38] sm:$0xff]  }
 0x1b2   : > { %v1993_v25 = vpop.eup %1992  ;;  %1890 = vmatprep.subr.bf16.mxu0 %v1956_v55 }
 0x1b3   : > { %2002 = vrsqrt.f32 %v858_v56  ;;  %v907_v52 = vpack.c.bf16 %v895_v46, %v894_v57  ;;  %v893_v41 = vmul.f32 %v1993_v25, %v833_v62  ;;  %1891 = vmatpush3.bf16.msra.mxu0 %v1956_v55  ;;  %v1957_v62 = vld [vmem:[%s2814_s9 + $0x30] sm:$0xff]  }
 0x1b4   : > { %v1995_v59 = vpop.eup %1994  ;;  %1892 = vmatprep.subr.bf16.mxu0 %v1957_v62 }
 0x1b5   : > { %v892_v50 = vmul.f32 %v1995_v59, %v832_v2  ;;  %v925_v60 = vmul.bf16 %v2341_v15, %v907_v52 }
 0x1b7   : > { %v906_v37 = vpack.c.bf16 %v893_v41, %v892_v50  ;;  %v943_v31 = vadd.bf16 %v2354_v45, %v925_v60  ;;  %1893 = vmatpush3.bf16.msra.mxu0 %v1957_v62  ;;  %v1958_v50 = vld [vmem:[%s2814_s9 + $0x28] sm:$0xff]  }
 0x1b8   : > { %1894 = vmatprep.subr.bf16.mxu0 %v1958_v50 }
 0x1b9   : > { %v924_v39 = vmul.bf16 %v2341_v15, %v906_v37  ;;  %v953_v54 = vmax.bf16 %v2052_v21, %v943_v31 }
 0x1ba   : > { %v1997_v1 = vpop.eup %1996 }
 0x1bb   : > { %v942_v5 = vadd.bf16 %v2354_v45, %v924_v39  ;;  %v897_v24 = vmul.f32 %v1997_v1, %v837_v3  ;;  %1895 = vmatpush3.bf16.msra.mxu0 %v1958_v50  ;;  %v1959_v39 = vld [vmem:[%s2814_s9 + $0x20] sm:$0xff]   ;;  %v1960_v3 = vld [vmem:[%s2814_s9 + $0x18] sm:$0xff]  }
 0x1bc   : > { %v1999_v11 = vpop.eup %1998  ;;  %1896 = vmatprep.subr.bf16.mxu0 %v1959_v39 }
 0x1bd   : > { %v952_v61 = vmax.bf16 %v2052_v21, %v942_v5  ;;  %v896_v20 = vmul.f32 %v1999_v11, %v836_v4 }
 0x1be   : > { %v2001_v51 = vpop.eup %2000 }
 0x1bf   : > { %1882 = vmatprep.mubr.bf16.mxu1 %v952_v61  ;;  %v908_v27 = vpack.c.bf16 %v897_v24, %v896_v20  ;;  %v899_v6 = vmul.f32 %v2001_v51, %v839_v43  ;;  %1897 = vmatpush3.bf16.msra.mxu0 %v1959_v39  ;;  %v1961_v20 = vld [vmem:[%s2814_s9 + $0x10] sm:$0xff]   ;;  %v1962_v43 = vld [vmem:[%s2814_s9 + $0x8] sm:$0xff]  }
 0x1c0   : > { %v2003_v42 = vpop.eup %2002  ;;  %1883 = vmatmul.mubr.bf16.gmra.mxu1 %v953_v54  ;;  %1898 = vmatprep.subr.bf16.mxu0 %v1960_v3 }
 0x1c1   : > { %v926_v29 = vmul.bf16 %v2341_v15, %v908_v27  ;;  %v898_v34 = vmul.f32 %v2003_v42, %v838_v47 }
 0x1c3   : > { %v944_v8 = vadd.bf16 %v2354_v45, %v926_v29  ;;  %v909_v9 = vpack.c.bf16 %v899_v6, %v898_v34  ;;  %1899 = vmatpush3.bf16.msra.mxu0 %v1960_v3  ;;  %v1963_v29 = vld [vmem:[%s2814_s9] sm:$0xff]  }
 0x1c4   : > { %1900 = vmatprep.subr.bf16.mxu0 %v1961_v20 }
 0x1c5   : > { %v954_v13 = vmax.bf16 %v2052_v21, %v944_v8  ;;  %v927_v22 = vmul.bf16 %v2341_v15, %v909_v9 }
 0x1c7   : > { %1886 = vmatprep.mubr.bf16.mxu1 %v954_v13  ;;  %v945_v12 = vadd.bf16 %v2354_v45, %v927_v22  ;;  %1901 = vmatpush3.bf16.msra.mxu0 %v1961_v20 }
 0x1c8   : > { %1902 = vmatprep.subr.bf16.mxu0 %v1962_v43 }
 0x1c9   : > { %v955_v17 = vmax.bf16 %v2052_v21, %v945_v12 }
 0x1cb   : > { %1887 = vmatmul.mubr.bf16.gmra.mxu1 %v955_v17  ;;  %1903 = vmatpush3.bf16.msra.mxu0 %v1962_v43 }
 0x1cc   : > { %1904 = vmatprep.subr.bf16.mxu0 %v1963_v29 }
 0x1cf   : > { %1905 = vmatpush3.bf16.msra.mxu0 %v1963_v29 }
 0x253   : > { %v1872_v38 = vpop.f32.mrf.mxu1 }
 0x254   : > { %v2468_v14 = vadd.f32 %v1872_v38, %v2465_v0 }
 0x255   : > { %v1061_v18 = vpop.f32.mrf.mxu1 }
 0x256   : > { %1144 = vadd.xlane.f32.xlu0 %v2468_v14  ;;  %v2472_v15 = vadd.f32 %v2465_v0, %v1061_v18  ;;  %v1202_v30 = vmul.f32 %v2468_v14, %v2468_v14 }
 0x257   : > { %v1873_v19 = vpop.f32.mrf.mxu1 }
 0x258   : > { %v2475_v45 = vadd.f32 %v1873_v19, %v2465_v0  ;;  %v1200_v33 = vmul.f32 %v2472_v15, %v2472_v15 }
 0x259   : > { %v1064_v23 = vpop.f32.mrf.mxu1 }
 0x25a   : > { %1146 = vadd.xlane.f32.xlu1 %v2475_v45  ;;  %1140 = vadd.xlane.f32.xlu0 %v2472_v15  ;;  %v2480_v26 = vadd.f32 %v2465_v0, %v1064_v23  ;;  %v1203_v32 = vmul.f32 %v2475_v45, %v2475_v45 }
 0x25c   : > { %v1201_v28 = vmul.f32 %v2480_v26, %v2480_v26 }
 0x25e   : > { %1142 = vadd.xlane.f32.xlu1 %v2480_v26  ;;  %1224 = vadd.xlane.f32.xlu0 %v1202_v30 }
 0x260   : > { %v1876_v35 = vpop.f32.mrf.mxu1 }
 0x261   : > { %v2490_v16 = vadd.f32 %v1876_v35, %v2465_v0 }
 0x262   : > { %1226 = vadd.xlane.f32.xlu1 %v1203_v32  ;;  %1220 = vadd.xlane.f32.xlu0 %v1200_v33  ;;  %v1077_v44 = vpop.f32.mrf.mxu1 }
 0x263   : > { %v2496_v36 = vadd.f32 %v2465_v0, %v1077_v44  ;;  %v1206_v48 = vmul.f32 %v2490_v16, %v2490_v16 }
 0x264   : > { %v1877_v7 = vpop.f32.mrf.mxu1 }
 0x265   : > { %v2499_v10 = vadd.f32 %v1877_v7, %v2465_v0  ;;  %v1204_v53 = vmul.f32 %v2496_v36, %v2496_v36 }
 0x266   : > { %1222 = vadd.xlane.f32.xlu1 %v1201_v28  ;;  %1152 = vadd.xlane.f32.xlu0 %v2490_v16  ;;  %v1080_v40 = vpop.f32.mrf.mxu1 }
 0x267   : > { %v2504_v58 = vadd.f32 %v2465_v0, %v1080_v40  ;;  %v1207_v49 = vmul.f32 %v2499_v10, %v2499_v10 }
 0x269   : > { %v1205_v25 = vmul.f32 %v2504_v58, %v2504_v58 }
 0x26a   : > { %1154 = vadd.xlane.f32.xlu1 %v2499_v10  ;;  %1148 = vadd.xlane.f32.xlu0 %v2496_v36 }
 0x26e   : > { %1150 = vadd.xlane.f32.xlu1 %v2504_v58  ;;  %1232 = vadd.xlane.f32.xlu0 %v1206_v48 }
 0x271   : > { %v1880_v56 = vpop.f32.mrf.mxu1 }
 0x272   : > { %1234 = vadd.xlane.f32.xlu1 %v1207_v49  ;;  %1228 = vadd.xlane.f32.xlu0 %v1204_v53  ;;  %v2517_v46 = vadd.f32 %v1880_v56, %v2465_v0 }
 0x273   : > { %v1093_v57 = vpop.f32.mrf.mxu1 }
 0x274   : > { %v2526_v52 = vadd.f32 %v2465_v0, %v1093_v57  ;;  %v1210_v37 = vmul.f32 %v2517_v46, %v2517_v46 }
 0x275   : > { %v1881_v2 = vpop.f32.mrf.mxu1 }
 0x276   : > { %1230 = vadd.xlane.f32.xlu1 %v1205_v25  ;;  %1160 = vadd.xlane.f32.xlu0 %v2517_v46  ;;  %v2529_v59 = vadd.f32 %v1881_v2, %v2465_v0  ;;  %v1208_v4 = vmul.f32 %v2526_v52, %v2526_v52 }
 0x277   : > { %v1096_v41 = vpop.f32.mrf.mxu1 }
 0x278   : > { %v2537_v60 = vadd.f32 %v2465_v0, %v1096_v41  ;;  %v1211_v1 = vmul.f32 %v2529_v59, %v2529_v59 }
 0x27a   : > { %1162 = vadd.xlane.f32.xlu1 %v2529_v59  ;;  %1156 = vadd.xlane.f32.xlu0 %v2526_v52  ;;  %v1209_v61 = vmul.f32 %v2537_v60, %v2537_v60 }
 0x27e   : > { %1158 = vadd.xlane.f32.xlu1 %v2537_v60  ;;  %1240 = vadd.xlane.f32.xlu0 %v1210_v37 }
 0x280   : > { %v1884_v31 = vpop.f32.mrf.mxu1 }
 0x281   : > { %v2553_v11 = vadd.f32 %v1884_v31, %v2465_v0 }
 0x282   : > { %1242 = vadd.xlane.f32.xlu1 %v1211_v1  ;;  %1236 = vadd.xlane.f32.xlu0 %v1208_v4  ;;  %v1109_v5 = vpop.f32.mrf.mxu1 }
 0x283   : > { %v2562_v51 = vadd.f32 %v2465_v0, %v1109_v5  ;;  %v1214_v42 = vmul.f32 %v2553_v11, %v2553_v11 }
 0x284   : > { %v1885_v24 = vpop.f32.mrf.mxu1 }
 0x285   : > { %v2565_v54 = vadd.f32 %v1885_v24, %v2465_v0  ;;  %v1212_v8 = vmul.f32 %v2562_v51, %v2562_v51 }
 0x286   : > { %1238 = vadd.xlane.f32.xlu1 %v1209_v61  ;;  %1168 = vadd.xlane.f32.xlu0 %v2553_v11  ;;  %v1112_v47 = vpop.f32.mrf.mxu1 }
 0x287   : > { %v2573_v27 = vadd.f32 %v2465_v0, %v1112_v47  ;;  %v1215_v6 = vmul.f32 %v2565_v54, %v2565_v54 }
 0x289   : > { %v1213_v22 = vmul.f32 %v2573_v27, %v2573_v27 }
 0x28a   : > { %1170 = vadd.xlane.f32.xlu1 %v2565_v54  ;;  %1164 = vadd.xlane.f32.xlu0 %v2562_v51 }
 0x28b   : > { %v1888_v34 = vpop.f32.mrf.mxu1 }
 0x28c   : > { %v2586_v13 = vadd.f32 %v1888_v34, %v2465_v0 }
 0x28d   : > { %v1125_v9 = vpop.f32.mrf.mxu1 }
 0x28e   : > { %1166 = vadd.xlane.f32.xlu1 %v2573_v27  ;;  %1248 = vadd.xlane.f32.xlu0 %v1214_v42  ;;  %v2592_v17 = vadd.f32 %v2465_v0, %v1125_v9  ;;  %v1218_v32 = vmul.f32 %v2586_v13, %v2586_v13 }
 0x28f   : > { %v1889_v12 = vpop.f32.mrf.mxu1 }
 0x290   : > { %v2595_v38 = vadd.f32 %v1889_v12, %v2465_v0  ;;  %v1216_v23 = vmul.f32 %v2592_v17, %v2592_v17 }
 0x291   : > { %v1128_v18 = vpop.f32.mrf.mxu1 }
 0x292   : > { %1250 = vadd.xlane.f32.xlu1 %v1215_v6  ;;  %1244 = vadd.xlane.f32.xlu0 %v1212_v8  ;;  %v2600_v19 = vadd.f32 %v2465_v0, %v1128_v18  ;;  %v1219_v33 = vmul.f32 %v2595_v38, %v2595_v38 }
 0x294   : > { %v1217_v30 = vmul.f32 %v2600_v19, %v2600_v19 }
 0x296   : > { %1246 = vadd.xlane.f32.xlu1 %v1213_v22  ;;  %1176 = vadd.xlane.f32.xlu0 %v2586_v13 }
 0x29a   : > { %1178 = vadd.xlane.f32.xlu1 %v2595_v38  ;;  %1172 = vadd.xlane.f32.xlu0 %v2592_v17 }
 0x29e   : > { %1174 = vadd.xlane.f32.xlu1 %v2600_v19  ;;  %1252 = vadd.xlane.f32.xlu0 %v1216_v23 }
 0x2a2   : > { %1254 = vadd.xlane.f32.xlu1 %v1217_v30  ;;  %1256 = vadd.xlane.f32.xlu0 %v1218_v32 }
 0x2a6   : > { %1258 = vadd.xlane.f32.xlu1 %v1219_v33 }
 0x2df   : > { %v1145_v0 = vpop.xlane.xlu0 %1144 }
 0x2e0   : > { %v2611_v28 = vmul.f32 0.020833334, %v1145_v0 }
 0x2e2   : > { %v1282_v49 = vmul.f32 %v2611_v28, %v2611_v28 }
 0x2e3   : > { %v1147_v35 = vpop.xlane.xlu1 %1146  ;;  %v1141_v44 = vpop.xlane.xlu0 %1140 }
 0x2e4   : > { %v2613_v7 = vmul.f32 0.020833334, %v1147_v35  ;;  %v2617_v53 = vmul.f32 0.020833334, %v1141_v44 }
 0x2e6   : > { %v1283_v57 = vmul.f32 %v2613_v7, %v2613_v7  ;;  %v1280_v50 = vmul.f32 %v2617_v53, %v2617_v53 }
 0x2e7   : > { %v1143_v40 = vpop.xlane.xlu1 %1142  ;;  %v1225_v48 = vpop.xlane.xlu0 %1224 }
 0x2e8   : > { %v1262_v55 = vmul.f32 0.020833334, %v1225_v48  ;;  %v2621_v25 = vmul.f32 0.020833334, %v1143_v40 }
 0x2ea   : > { %v1302_v56 = vsub.f32 %v1262_v55, %v1282_v49  ;;  %v1281_v61 = vmul.f32 %v2621_v25, %v2621_v25  ;;  %v1430_v49 = vld [vmem:[%s2812_s7] sm:$0x1] }
 0x2eb   : > { %v1227_v62 = vpop.xlane.xlu1 %1226  ;;  %v1221_v2 = vpop.xlane.xlu0 %1220 }
 0x2ec   : > { %v1322_v41 = vmax.f32 %v1302_v56, 0.0  ;;  %v1263_v37 = vmul.f32 0.020833334, %v1227_v62  ;;  %v1260_v39 = vmul.f32 0.020833334, %v1221_v2 }
 0x2ee   : > { %v1303_v31 = vsub.f32 %v1263_v37, %v1283_v57  ;;  %v1300_v1 = vsub.f32 %v1260_v39, %v1280_v50  ;;  %v1362_v4 = vadd.f32 1e-05, %v1322_v41  ;;  %v1448_v41 = vld [vmem:[%s2813_s8] sm:$0x1]  ;;  %v1343_v37 = vsub.f32 %v2475_v45, %v2613_v7 }
 0x2ef   : > { %v1223_v3 = vpop.xlane.xlu1 %1222  ;;  %v1153_v5 = vpop.xlane.xlu0 %1152 }
 0x2f0   : > { %v1323_v20 = vmax.f32 %v1303_v31, 0.0  ;;  %v1320_v24 = vmax.f32 %v1300_v1, 0.0  ;;  %v1261_v43 = vmul.f32 0.020833334, %v1223_v3  ;;  %2004 = vrsqrt.f32 %v1362_v4 }
 0x2f1   : > { %v2627_v9 = vmul.f32 0.020833334, %v1153_v5  ;;  %v1432_v4 = vpack.i.b16 %v1430_v49, %v1430_v49 }
 0x2f2   : > { %v1363_v47 = vadd.f32 1e-05, %v1323_v20  ;;  %v1301_v42 = vsub.f32 %v1261_v43, %v1281_v61  ;;  %v1360_v29 = vadd.f32 1e-05, %v1320_v24 }
 0x2f3   : > { %v1155_v34 = vpop.xlane.xlu1 %1154  ;;  %v1149_v6 = vpop.xlane.xlu0 %1148  ;;  %v1286_v30 = vmul.f32 %v2627_v9, %v2627_v9 }
 0x2f4   : > { %2006 = vrsqrt.f32 %v1363_v47  ;;  %v1321_v8 = vmax.f32 %v1301_v42, 0.0  ;;  %v2629_v12 = vmul.f32 0.020833334, %v1155_v34  ;;  %v2633_v32 = vmul.f32 0.020833334, %v1149_v6 }
 0x2f5   : > { %2008 = vrsqrt.f32 %v1360_v29  ;;  %v1342_v47 = vsub.f32 %v2468_v14, %v2611_v28  ;;  %v1450_v42 = vpack.i.b16 %v1448_v41, %v1448_v41  ;;  %v1340_v14 = vsub.f32 %v2472_v15, %v2617_v53 }
 0x2f6   : > { %v1361_v22 = vadd.f32 1e-05, %v1321_v8  ;;  %v1287_v35 = vmul.f32 %v2629_v12, %v2629_v12  ;;  %v1284_v55 = vmul.f32 %v2633_v32, %v2633_v32  ;;  %v1341_v28 = vsub.f32 %v2480_v26, %v2621_v25 }
 0x2f7   : > { %v1151_v18 = vpop.xlane.xlu1 %1150  ;;  %v1233_v23 = vpop.xlane.xlu0 %1232 }
 0x2f8   : > { %2010 = vrsqrt.f32 %v1361_v22  ;;  %v1266_v33 = vmul.f32 0.020833334, %v1233_v23  ;;  %v2637_v44 = vmul.f32 0.020833334, %v1151_v18 }
 0x2fa   : > { %v1306_v0 = vsub.f32 %v1266_v33, %v1286_v30  ;;  %v1285_v5 = vmul.f32 %v2637_v44, %v2637_v44  ;;  %v2656_v33 = vrot.slane %v1432_v4, %v2335_v63 }
 0x2fb   : > { %v1235_v40 = vpop.xlane.xlu1 %1234  ;;  %v1229_v48 = vpop.xlane.xlu0 %1228 }
 0x2fc   : > { %v1326_v56 = vmax.f32 %v1306_v0, 0.0  ;;  %v1267_v57 = vmul.f32 0.020833334, %v1235_v40  ;;  %v1264_v62 = vmul.f32 0.020833334, %v1229_v48  ;;  %v2663_v48 = vrot.slane %v1450_v42, %v2335_v63 }
 0x2fd   : > { %v2005_v3 = vpop.eup %2004 }
 0x2fe   : > { %v1307_v2 = vsub.f32 %v1267_v57, %v1287_v35  ;;  %v1304_v50 = vsub.f32 %v1264_v62, %v1284_v55  ;;  %v1366_v39 = vadd.f32 1e-05, %v1326_v56  ;;  %v1402_v7 = vmul.f32 %v2005_v3, %v1342_v47 }
 0x2ff   : > { %v1231_v31 = vpop.xlane.xlu1 %1230  ;;  %v1161_v1 = vpop.xlane.xlu0 %1160  ;;  %v1347_v47 = vsub.f32 %v2499_v10, %v2629_v12 }
 0x300   : > { %v1327_v61 = vmax.f32 %v1307_v2, 0.0  ;;  %v1324_v20 = vmax.f32 %v1304_v50, 0.0  ;;  %v1265_v24 = vmul.f32 0.020833334, %v1231_v31  ;;  %2012 = vrsqrt.f32 %v1366_v39 }
 0x301   : > { %v2007_v43 = vpop.eup %2006  ;;  %v2653_v30 = vmul.f32 0.020833334, %v1161_v1 }
 0x302   : > { %v1403_v29 = vmul.f32 %v2007_v43, %v1343_v37  ;;  %v1367_v34 = vadd.f32 1e-05, %v1327_v61  ;;  %v1364_v6 = vadd.f32 1e-05, %v1324_v20  ;;  %v1305_v45 = vsub.f32 %v1265_v24, %v1285_v5  ;;  %v2009_v18 = vpop.eup %2008 }
 0x303   : > { %v1163_v8 = vpop.xlane.xlu1 %1162  ;;  %v1157_v22 = vpop.xlane.xlu0 %1156  ;;  %v1400_v62 = vmul.f32 %v2009_v18, %v1340_v14  ;;  %v1290_v15 = vmul.f32 %v2653_v30, %v2653_v30  ;;  %v1346_v14 = vsub.f32 %v2490_v16, %v2627_v9  ;;  %v1345_v16 = vsub.f32 %v2504_v58, %v2637_v44 }
 0x304   : > { %2014 = vrsqrt.f32 %v1367_v34  ;;  %v1325_v23 = vmax.f32 %v1305_v45, 0.0  ;;  %v1421_v35 = vpack.c.bf16 %v1403_v29, %v1402_v7  ;;  %v2665_v49 = vmul.f32 0.020833334, %v1163_v8 }
 0x305   : > { %v2011_v0 = vpop.eup %2010  ;;  %2016 = vrsqrt.f32 %v1364_v6  ;;  %v2667_v55 = vmul.f32 0.020833334, %v1157_v22 }
 0x306   : > { %v1365_v40 = vadd.f32 1e-05, %v1325_v23  ;;  %v1401_v2 = vmul.f32 %v2011_v0, %v1341_v28  ;;  %v1439_v26 = vmul.bf16 %v2656_v33, %v1421_v35  ;;  %v1291_v63 = vmul.f32 %v2665_v49, %v2665_v49 }
 0x307   : > { %v1159_v56 = vpop.xlane.xlu1 %1158  ;;  %v1241_v57 = vpop.xlane.xlu0 %1240  ;;  %v1288_v41 = vmul.f32 %v2667_v55, %v2667_v55 }
 0x308   : > { %2018 = vrsqrt.f32 %v1365_v40  ;;  %v1270_v53 = vmul.f32 0.020833334, %v1241_v57  ;;  %v1420_v25 = vpack.c.bf16 %v1401_v2, %v1400_v62  ;;  %v2676_v37 = vmul.f32 0.020833334, %v1159_v56 }
 0x309   : > { %v1457_v61 = vadd.bf16 %v2663_v48, %v1439_v26  ;;  %v1344_v2 = vsub.f32 %v2496_v36, %v2633_v32 }
 0x30a   : > { %v1310_v50 = vsub.f32 %v1270_v53, %v1290_v15  ;;  %v1438_v1 = vmul.bf16 %v2656_v33, %v1420_v25  ;;  %v1289_v42 = vmul.f32 %v2676_v37, %v2676_v37 }
 0x30b   : > { %v1243_v39 = vpop.xlane.xlu1 %1242  ;;  %v1237_v31 = vpop.xlane.xlu0 %1236  ;;  %v1467_v23 = vmax.bf16 %v2052_v21, %v1457_v61 }
 0x30c   : > { %v1330_v4 = vmax.f32 %v1310_v50, 0.0  ;;  %v1271_v3 = vmul.f32 0.020833334, %v1243_v39  ;;  %v1268_v5 = vmul.f32 0.020833334, %v1237_v31  ;;  %v1456_v20 = vadd.bf16 %v2663_v48, %v1438_v1 }
 0x30d   : > { %v2013_v7 = vpop.eup %2012 }
 0x30e   : > { %v1311_v24 = vsub.f32 %v1271_v3, %v1291_v63  ;;  %v1308_v43 = vsub.f32 %v1268_v5, %v1288_v41  ;;  %v1370_v29 = vadd.f32 1e-05, %v1330_v4  ;;  %v1466_v45 = vmax.bf16 %v2052_v21, %v1456_v20 }
 0x30f   : > { %v1239_v34 = vpop.xlane.xlu1 %1238  ;;  %v1169_v6 = vpop.xlane.xlu0 %1168  ;;  %v1406_v62 = vmul.f32 %v2013_v7, %v1346_v14 }
 0x310   : > { %v1331_v8 = vmax.f32 %v1311_v24, 0.0  ;;  %v1328_v22 = vmax.f32 %v1308_v43, 0.0  ;;  %v1269_v18 = vmul.f32 0.020833334, %v1239_v34  ;;  %1906 = vmatprep.mubr.bf16.mxu0 %v1466_v45  ;;  %2020 = vrsqrt.f32 %v1370_v29 }
 0x311   : > { %v2015_v0 = vpop.eup %2014  ;;  %1907 = vmatmul.mubr.bf16.vlgmr.msra.gmra.mxu0 %v1467_v23  ;;  %v2691_v53 = vmul.f32 0.020833334, %v1169_v6 }
 0x312   : > { %v1371_v10 = vadd.f32 1e-05, %v1331_v8  ;;  %v1309_v12 = vsub.f32 %v1269_v18, %v1289_v42  ;;  %v1407_v28 = vmul.f32 %v2015_v0, %v1347_v47  ;;  %v2017_v35 = vpop.eup %2016  ;;  %v1368_v40 = vadd.f32 1e-05, %v1328_v22 }
 0x313   : > { %v1171_v56 = vpop.xlane.xlu1 %1170  ;;  %v1165_v57 = vpop.xlane.xlu0 %1164  ;;  %v1404_v50 = vmul.f32 %v2017_v35, %v1344_v2  ;;  %v1294_v36 = vmul.f32 %v2691_v53, %v2691_v53  ;;  %v1351_v22 = vsub.f32 %v2529_v59, %v2665_v49 }
 0x314   : > { %2022 = vrsqrt.f32 %v1371_v10  ;;  %v1329_v15 = vmax.f32 %v1309_v12, 0.0  ;;  %v1423_v9 = vpack.c.bf16 %v1407_v28, %v1406_v62  ;;  %v2695_v63 = vmul.f32 0.020833334, %v1171_v56 }
 0x315   : > { %v2019_v26 = vpop.eup %2018  ;;  %2024 = vrsqrt.f32 %v1368_v40  ;;  %v2697_v41 = vmul.f32 0.020833334, %v1165_v57  ;;  %v1350_v57 = vsub.f32 %v2517_v46, %v2653_v30  ;;  %v1349_v46 = vsub.f32 %v2537_v60, %v2676_v37 }
 0x316   : > { %v1369_v25 = vadd.f32 1e-05, %v1329_v15  ;;  %v1405_v1 = vmul.f32 %v2019_v26, %v1345_v16  ;;  %v1441_v4 = vmul.bf16 %v2656_v33, %v1423_v9  ;;  %v1295_v44 = vmul.f32 %v2695_v63, %v2695_v63 }
 0x317   : > { %v1167_v39 = vpop.xlane.xlu1 %1166  ;;  %v1249_v31 = vpop.xlane.xlu0 %1248  ;;  %v1292_v5 = vmul.f32 %v2697_v41, %v2697_v41 }
 0x318   : > { %2026 = vrsqrt.f32 %v1369_v25  ;;  %v1274_v32 = vmul.f32 0.020833334, %v1249_v31  ;;  %v1422_v3 = vpack.c.bf16 %v1405_v1, %v1404_v50  ;;  %v2706_v61 = vmul.f32 0.020833334, %v1167_v39 }
 0x319   : > { %v1459_v34 = vadd.bf16 %v2663_v48, %v1441_v4  ;;  %v1348_v31 = vsub.f32 %v2526_v52, %v2667_v55 }
 0x31a   : > { %v1314_v58 = vsub.f32 %v1274_v32, %v1294_v36  ;;  %v1440_v43 = vmul.bf16 %v2656_v33, %v1422_v3  ;;  %v1293_v18 = vmul.f32 %v2706_v61, %v2706_v61 }
 0x31b   : > { %v1251_v20 = vpop.xlane.xlu1 %1250  ;;  %v1245_v24 = vpop.xlane.xlu0 %1244  ;;  %v1469_v40 = vmax.bf16 %v2052_v21, %v1459_v34 }
 0x31c   : > { %v1334_v47 = vmax.f32 %v1314_v58, 0.0  ;;  %v1275_v42 = vmul.f32 0.020833334, %v1251_v20  ;;  %v1272_v29 = vmul.f32 0.020833334, %v1245_v24  ;;  %v1458_v6 = vadd.bf16 %v2663_v48, %v1440_v43 }
 0x31d   : > { %v2021_v10 = vpop.eup %2020 }
 0x31e   : > { %v1374_v45 = vadd.f32 1e-05, %v1334_v47  ;;  %v1315_v7 = vsub.f32 %v1275_v42, %v1295_v44  ;;  %v1312_v8 = vsub.f32 %v1272_v29, %v1292_v5  ;;  %v1468_v14 = vmax.bf16 %v2052_v21, %v1458_v6 }
 0x31f   : > { %v1247_v23 = vpop.xlane.xlu1 %1246  ;;  %v1177_v0 = vpop.xlane.xlu0 %1176  ;;  %v1410_v16 = vmul.f32 %v2021_v10, %v1350_v57  ;;  %v1355_v10 = vsub.f32 %v2565_v54, %v2695_v63 }
 0x320   : > { %v1335_v12 = vmax.f32 %v1315_v7, 0.0  ;;  %v1332_v28 = vmax.f32 %v1312_v8, 0.0  ;;  %v1273_v35 = vmul.f32 0.020833334, %v1247_v23  ;;  %2028 = vrsqrt.f32 %v1374_v45  ;;  %1910 = vmatprep.mubr.bf16.mxu0 %v1468_v14 }
 0x321   : > { %v2023_v56 = vpop.eup %2022  ;;  %1911 = vmatmul.mubr.bf16.gmra.mxu0 %v1469_v40  ;;  %v2725_v36 = vmul.f32 0.020833334, %v1177_v0  ;;  %v1354_v14 = vsub.f32 %v2553_v11, %v2691_v53 }
 0x322   : > { %v1375_v59 = vadd.f32 1e-05, %v1335_v12  ;;  %v1372_v49 = vadd.f32 1e-05, %v1332_v28  ;;  %v1313_v62 = vsub.f32 %v1273_v35, %v1293_v18  ;;  %v1411_v2 = vmul.f32 %v2023_v56, %v1351_v22  ;;  %v2025_v9 = vpop.eup %2024 }
 0x323   : > { %v1179_v15 = vpop.xlane.xlu1 %1178  ;;  %v1173_v26 = vpop.xlane.xlu0 %1172  ;;  %v1408_v3 = vmul.f32 %v2025_v9, %v1348_v31  ;;  %v1298_v37 = vmul.f32 %v2725_v36, %v2725_v36 }
 0x324   : > { %2030 = vrsqrt.f32 %v1375_v59  ;;  %v1333_v25 = vmax.f32 %v1313_v62, 0.0  ;;  %v2719_v50 = vmul.f32 0.020833334, %v1173_v26  ;;  %v1425_v30 = vpack.c.bf16 %v1411_v2, %v1410_v16 }
 0x325   : > { %v2027_v39 = vpop.eup %2026  ;;  %2032 = vrsqrt.f32 %v1372_v49  ;;  %v2734_v24 = vmul.f32 0.020833334, %v1179_v15  ;;  %v1352_v15 = vsub.f32 %v2562_v51, %v2697_v41  ;;  %v1353_v26 = vsub.f32 %v2573_v27, %v2706_v61 }
 0x326   : > { %v1373_v1 = vadd.f32 1e-05, %v1333_v25  ;;  %v1409_v58 = vmul.f32 %v2027_v39, %v1349_v46  ;;  %v1443_v44 = vmul.bf16 %v2656_v33, %v1425_v30  ;;  %v1296_v5 = vmul.f32 %v2719_v50, %v2719_v50 }
 0x327   : > { %v1175_v32 = vpop.xlane.xlu1 %1174  ;;  %v1253_v4 = vpop.xlane.xlu0 %1252  ;;  %v1299_v12 = vmul.f32 %v2734_v24, %v2734_v24 }
 0x328   : > { %2034 = vrsqrt.f32 %v1373_v1  ;;  %v2730_v20 = vmul.f32 0.020833334, %v1175_v32  ;;  %v1276_v52 = vmul.f32 0.020833334, %v1253_v4  ;;  %v1424_v55 = vpack.c.bf16 %v1409_v58, %v1408_v3 }
 0x329   : > { %v1461_v29 = vadd.bf16 %v2663_v48, %v1443_v44  ;;  %v1356_v3 = vsub.f32 %v2592_v17, %v2719_v50 }
 0x32a   : > { %v1316_v60 = vsub.f32 %v1276_v52, %v1296_v5  ;;  %v1442_v42 = vmul.bf16 %v2656_v33, %v1424_v55  ;;  %v1297_v34 = vmul.f32 %v2730_v20, %v2730_v20  ;;  %v1357_v58 = vsub.f32 %v2600_v19, %v2730_v20 }
 0x32b   : > { %v1255_v43 = vpop.xlane.xlu1 %1254  ;;  %v1257_v47 = vpop.xlane.xlu0 %1256  ;;  %v1471_v59 = vmax.bf16 %v2052_v21, %v1461_v29 }
 0x32c   : > { %v1336_v6 = vmax.f32 %v1316_v60, 0.0  ;;  %v1277_v45 = vmul.f32 0.020833334, %v1255_v43  ;;  %v1278_v7 = vmul.f32 0.020833334, %v1257_v47  ;;  %v1460_v8 = vadd.bf16 %v2663_v48, %v1442_v42 }
 0x32d   : > { %v2029_v22 = vpop.eup %2028  ;;  %v1358_v60 = vsub.f32 %v2586_v13, %v2725_v36 }
 0x32e   : > { %v1376_v18 = vadd.f32 1e-05, %v1336_v6  ;;  %v1317_v23 = vsub.f32 %v1277_v45, %v1297_v34  ;;  %v1318_v0 = vsub.f32 %v1278_v7, %v1298_v37  ;;  %v1470_v35 = vmax.bf16 %v2052_v21, %v1460_v8 }
 0x32f   : > { %v1259_v28 = vpop.xlane.xlu1 %1258  ;;  %v1414_v62 = vmul.f32 %v2029_v22, %v1354_v14  ;;  %v1359_v37 = vsub.f32 %v2595_v38, %v2734_v24  ;;  %v1774_v38 = vld [vmem:[%s2815_s10] ss:$0 sm:$0xff] }
 0x330   : > { %v1337_v40 = vmax.f32 %v1317_v23, 0.0  ;;  %v1338_v56 = vmax.f32 %v1318_v0, 0.0  ;;  %v1279_v57 = vmul.f32 0.020833334, %v1259_v28  ;;  %2036 = vrsqrt.f32 %v1376_v18  ;;  %1914 = vmatprep.mubr.bf16.mxu0 %v1470_v35 }
 0x331   : > { %v2031_v49 = vpop.eup %2030  ;;  %1915 = vmatmul.mubr.bf16.gmra.mxu0 %v1471_v59 }
 0x332   : > { %v1377_v2 = vadd.f32 1e-05, %v1337_v40  ;;  %v1378_v11 = vadd.f32 1e-05, %v1338_v56  ;;  %v1319_v53 = vsub.f32 %v1279_v57, %v1299_v12  ;;  %v1415_v54 = vmul.f32 %v2031_v49, %v1355_v10  ;;  %v2033_v63 = vpop.eup %2032 }
 0x333   : > { %v1412_v31 = vmul.f32 %v2033_v63, %v1352_v15 }
 0x334   : > { %2038 = vrsqrt.f32 %v1377_v2  ;;  %v1339_v16 = vmax.f32 %v1319_v53, 0.0  ;;  %v1427_v9 = vpack.c.bf16 %v1415_v54, %v1414_v62 }
 0x335   : > { %v2035_v25 = vpop.eup %2034  ;;  %2040 = vrsqrt.f32 %v1378_v11 }
 0x336   : > { %v1379_v39 = vadd.f32 1e-05, %v1339_v16  ;;  %v1413_v46 = vmul.f32 %v2035_v25, %v1353_v26  ;;  %v1445_v30 = vmul.bf16 %v2656_v33, %v1427_v9 }
 0x338   : > { %2042 = vrsqrt.f32 %v1379_v39  ;;  %v1426_v1 = vpack.c.bf16 %v1413_v46, %v1412_v31  ;;  %v1463_v4 = vadd.bf16 %v2663_v48, %v1445_v30 }
 0x33a   : > { %v1444_v32 = vmul.bf16 %v2656_v33, %v1426_v1  ;;  %v1473_v61 = vmax.bf16 %v2052_v21, %v1463_v4 }
 0x33c   : > { %v1462_v51 = vadd.bf16 %v2663_v48, %v1444_v32 }
 0x33d   : > { %v2037_v41 = vpop.eup %2036 }
 0x33e   : > { %v1472_v27 = vmax.bf16 %v2052_v21, %v1462_v51  ;;  %v1416_v5 = vmul.f32 %v2037_v41, %v1356_v3 }
 0x340   : > { %1918 = vmatprep.mubr.bf16.mxu0 %v1472_v27 }
 0x341   : > { %v2039_v44 = vpop.eup %2038  ;;  %1919 = vmatmul.mubr.bf16.gmra.mxu0 %v1473_v61 }
 0x342   : > { %v1417_v52 = vmul.f32 %v2039_v44, %v1357_v58  ;;  %v2041_v55 = vpop.eup %2040 }
 0x343   : > { %v1418_v50 = vmul.f32 %v2041_v55, %v1358_v60 }
 0x344   : > { %v1428_v43 = vpack.c.bf16 %v1417_v52, %v1416_v5 }
 0x345   : > { %v2043_v47 = vpop.eup %2042 }
 0x346   : > { %v1446_v17 = vmul.bf16 %v2656_v33, %v1428_v43  ;;  %v1419_v42 = vmul.f32 %v2043_v47, %v1359_v37 }
 0x348   : > { %v1464_v19 = vadd.bf16 %v2663_v48, %v1446_v17  ;;  %v1429_v20 = vpack.c.bf16 %v1419_v42, %v1418_v50 }
 0x34a   : > { %v1474_v29 = vmax.bf16 %v2052_v21, %v1464_v19  ;;  %v1447_v34 = vmul.bf16 %v2656_v33, %v1429_v20 }
 0x34c   : > { %1922 = vmatprep.mubr.bf16.mxu0 %v1474_v29  ;;  %v1465_v6 = vadd.bf16 %v2663_v48, %v1447_v34 }
 0x34e   : > { %v1475_v13 = vmax.bf16 %v2052_v21, %v1465_v6 }
 0x350   : > { %1923 = vmatmul.mubr.bf16.gmra.mxu0 %v1475_v13 }
 0x3d1   : > { %v1908_v33 = vpop.f32.mrf.mxu0 }
 0x3d2   : > { %v1590_v48 = vadd.f32 %v1908_v33, %v1774_v38 }
 0x3d3   : > { %v1581_v36 = vpop.f32.mrf.mxu0 }
 0x3d4   : > { %1662 = vst [vmem:[%s2780_s24 + $0x10] sm:$0xff] %v1590_v48  ;;  %v1582_v21 = vadd.f32 %v1774_v38, %v1581_v36 }
 0x3d5   : > { %v1909_v24 = vpop.f32.mrf.mxu0 }
 0x3d6   : > { %1660 = vst [vmem:[%s2780_s24] sm:$0xff] %v1582_v21  ;;  %v1593_v45 = vadd.f32 %v1909_v24, %v1774_v38 }
 0x3d7   : > { %v1584_v7 = vpop.f32.mrf.mxu0 }
 0x3d8   : > { %1663 = vst [vmem:[%s2780_s24 + $0x18] sm:$0xff] %v1593_v45  ;;  %v1585_v8 = vadd.f32 %v1774_v38, %v1584_v7 }
 0x3da   : > { %1661 = vst [vmem:[%s2780_s24 + $0x8] sm:$0xff] %v1585_v8 }
 0x3e1   : > { %v1912_v22 = vpop.f32.mrf.mxu0 }
 0x3e2   : > { %v1606_v18 = vadd.f32 %v1912_v22, %v1774_v38 }
 0x3e3   : > { %v1597_v23 = vpop.f32.mrf.mxu0 }
 0x3e4   : > { %1666 = vst [vmem:[%s2780_s24 + $0x30] sm:$0xff] %v1606_v18  ;;  %v1598_v0 = vadd.f32 %v1774_v38, %v1597_v23 }
 0x3e5   : > { %v1913_v14 = vpop.f32.mrf.mxu0 }
 0x3e6   : > { %1664 = vst [vmem:[%s2780_s24 + $0x20] sm:$0xff] %v1598_v0  ;;  %v1609_v10 = vadd.f32 %v1913_v14, %v1774_v38 }
 0x3e7   : > { %v1600_v12 = vpop.f32.mrf.mxu0 }
 0x3e8   : > { %1667 = vst [vmem:[%s2780_s24 + $0x38] sm:$0xff] %v1609_v10  ;;  %v1601_v28 = vadd.f32 %v1774_v38, %v1600_v12 }
 0x3ea   : > { %1665 = vst [vmem:[%s2780_s24 + $0x28] sm:$0xff] %v1601_v28 }
 0x3f1   : > { %v1916_v35 = vpop.f32.mrf.mxu0 }
 0x3f2   : > { %v1622_v40 = vadd.f32 %v1916_v35, %v1774_v38 }
 0x3f3   : > { %v1613_v56 = vpop.f32.mrf.mxu0 }
 0x3f4   : > { %1670 = vst [vmem:[%s2780_s24 + $0x50] sm:$0xff] %v1622_v40  ;;  %v1614_v57 = vadd.f32 %v1774_v38, %v1613_v56 }
 0x3f5   : > { %v1917_v59 = vpop.f32.mrf.mxu0 }
 0x3f6   : > { %1668 = vst [vmem:[%s2780_s24 + $0x40] sm:$0xff] %v1614_v57  ;;  %v1625_v49 = vadd.f32 %v1917_v59, %v1774_v38 }
 0x3f7   : > { %v1616_v62 = vpop.f32.mrf.mxu0 }
 0x3f8   : > { %1671 = vst [vmem:[%s2780_s24 + $0x58] sm:$0xff] %v1625_v49  ;;  %v1617_v2 = vadd.f32 %v1774_v38, %v1616_v62 }
 0x3fa   : > { %1669 = vst [vmem:[%s2780_s24 + $0x48] sm:$0xff] %v1617_v2 }
 0x401   : > { %v1920_v11 = vpop.f32.mrf.mxu0 }
 0x402   : > { %v1638_v53 = vadd.f32 %v1920_v11, %v1774_v38 }
 0x403   : > { %v1629_v54 = vpop.f32.mrf.mxu0 }
 0x404   : > { %1674 = vst [vmem:[%s2780_s24 + $0x70] sm:$0xff] %v1638_v53  ;;  %v1630_v63 = vadd.f32 %v1774_v38, %v1629_v54 }
 0x405   : > { %v1921_v15 = vpop.f32.mrf.mxu0 }
 0x406   : > { %1672 = vst [vmem:[%s2780_s24 + $0x60] sm:$0xff] %v1630_v63  ;;  %v1641_v26 = vadd.f32 %v1921_v15, %v1774_v38 }
 0x407   : > { %v1632_v16 = vpop.f32.mrf.mxu0 }
 0x408   : > { %1675 = vst [vmem:[%s2780_s24 + $0x78] sm:$0xff] %v1641_v26  ;;  %v1633_v9 = vadd.f32 %v1774_v38, %v1632_v16 }
 0x40a   : > { %1673 = vst [vmem:[%s2780_s24 + $0x68] sm:$0xff] %v1633_v9 }
 0x410   : > { %v1924_v25 = vpop.f32.mrf.mxu0 }
 0x411   : > { %v1654_v39 = vadd.f32 %v1924_v25, %v1774_v38 }
 0x412   : > { %v1645_v31 = vpop.f32.mrf.mxu0 }
 0x413   : > { %1678 = vst [vmem:[%s2780_s24 + $0x90] sm:$0xff] %v1654_v39  ;;  %v1646_v46 = vadd.f32 %v1774_v38, %v1645_v31 }
 0x414   : > { %v1925_v30 = vpop.f32.mrf.mxu0 }
 0x415   : > { %1676 = vst [vmem:[%s2780_s24 + $0x80] sm:$0xff] %v1646_v46  ;;  %v1657_v1 = vadd.f32 %v1925_v30, %v1774_v38 }
 0x416   : > { %v1648_v32 = vpop.f32.mrf.mxu0 }
 0x417   : > { %1679 = vst [vmem:[%s2780_s24 + $0x98] sm:$0xff] %v1657_v1  ;;  %v1649_v4 = vadd.f32 %v1774_v38, %v1648_v32 }
 0x419   : > { %1677 = vst [vmem:[%s2780_s24 + $0x88] sm:$0xff] %v1649_v4 }
 0x41a PF: > { %s21_s17 = sadd.s32 1, %s2050_s17  }
 0x41b   : > { %p18_p4 = scmp.ge.s32.totalorder %s21_s17, 4  }
 0x41d   :  { %20 = sbr.rel (!%p18_p4) target bundleno = 1 (0x1), region = 94 }

</bundles_post_ra>
